<compile_context>
chip_gen: v7x
topology: tpu7x:2x2x1
jax: 0.10.0
libtpu: 0.0.40
codegen_flags: <defaults>
</compile_context>

<pallas_src>
import functools

import jax
import jax.numpy as jnp
from jax.experimental import pallas as pl
from jax.experimental.pallas import tpu as pltpu


NEG_INF = -9.0e15  # matches the float32 branch of the PyTorch module


def _leaky_relu(x, alpha):
    return jnp.where(x > 0, x, alpha * x)


def _elu(x):
    # exp argument clamped to <= 0 so the untaken branch cannot overflow.
    return jnp.where(x > 0, x, jnp.exp(jnp.minimum(x, 0.0)) - 1.0)


def _masked_softmax(e, bias):
    # `bias` is 0 where adj > 0 and -9e15 elsewhere; identical to the torch
    # `where(adj > 0, e, -9e15)` softmax for every row with at least one edge
    # (the harness adds self-loops, so no row is fully masked).
    att = e + bias
    att = att - jnp.max(att, axis=-1, keepdims=True)
    p = jnp.exp(att)
    denom = jnp.sum(p, axis=-1, keepdims=True)           # >= 1 (max entry is 1)
    return p * pl.reciprocal(denom, approx=True)         # EUP slot, not VALU


# ---------------------------------------------------------------------------
# Fused kernel: all nheads input GAT layers + eval BatchNorm + the three
# output GAT layers + their epilogues, for ONE batch element per grid step.
# ---------------------------------------------------------------------------
def _gat_fused_kernel(adj_ref, x_ref, w_all_ref, a_all_ref,
                      bn_scale_ref, bn_shift_ref,
                      w_out_ref, a_out_ref, w2_ref,
                      sent_ref, para_ref, qtype_ref, *,
                      alpha, nheads, hidden, nclass):
    # adj_ref      : (1, N, N)  int8   adjacency mask for this batch element
    # x_ref        : (1, N, F)  f32    node features
    # w_all_ref    : (F, C)     bf16   all heads' W stacked column-wise
    # a_all_ref    : (C, 2*nheads) bf16 block-diag [a1 | a2] per head
    # bn_scale/shift: (N, 1)    f32    eval BatchNorm1d(nodes_num) affine
    # w_out_ref    : (C, Ktot)  bf16   [W_sent | W_para | W_qtype]
    # a_out_ref    : (Ktot, 6)  bf16   block-diag packed a's of the 3 layers
    # w2_ref       : (hidden, 2) bf16
    # sent_ref     : (1, N, nclass)    sigmoid(out_att_sent)
    # para_ref     : (1, N, nclass)    elu(out_att_para)
    # qtype_ref    : (1, 1, 2)         elu(out_att_Qtype[:, 0, :] @ W2)
    N = x_ref.shape[1]

    # Additive adjacency bias built in-kernel from the int8 mask (one select).
    adj_f = adj_ref[0].astype(jnp.float32)                          # (N, N)
    bias = jnp.where(adj_f > 0.0, 0.0, NEG_INF)                     # (N, N)

    # ---------------- Layer 1: all nheads heads -----------------------------
    x = x_ref[0].astype(jnp.bfloat16)                               # (N, F)
    h = jnp.dot(x, w_all_ref[...],
                preferred_element_type=jnp.float32)                 # (N, C) f32
    h_bf = h.astype(jnp.bfloat16)
    f = jnp.dot(h_bf, a_all_ref[...],
                preferred_element_type=jnp.float32)                 # (N, 2*nheads)
    f2t = f[:, nheads:].T                                           # (nheads, N): 1 transpose

    parts = []
    for hd in range(nheads):
        e = _leaky_relu(f[:, hd:hd + 1] + f2t[hd:hd + 1, :], alpha)  # (N, N)
        att = _masked_softmax(e, bias)
        h_head = h_bf[:, hd * hidden:(hd + 1) * hidden]              # (N, hidden)
        hp = jnp.dot(att.astype(jnp.bfloat16), h_head,
                     preferred_element_type=jnp.float32)             # (N, hidden)
        parts.append(_elu(hp))
    xcat = jnp.concatenate(parts, axis=-1)                           # (N, C) lane-dense

    # ---------------- eval BatchNorm1d(nodes_num): per-node affine ----------
    x2 = (xcat * bn_scale_ref[...] + bn_shift_ref[...]).astype(jnp.bfloat16)

    # ---------------- Output layers: merged projection ----------------------
    hout = jnp.dot(x2, w_out_ref[...],
                   preferred_element_type=jnp.float32)               # (N, Ktot)
    fout = jnp.dot(hout.astype(jnp.bfloat16), a_out_ref[...],
                   preferred_element_type=jnp.float32)               # (N, 6)
    f2o = fout[:, 3:6].T                                             # (3, N): 1 transpose

    # sent: sigmoid(att @ h_sent)
    e_s = _leaky_relu(fout[:, 0:1] + f2o[0:1, :], alpha)
    att_s = _masked_softmax(e_s, bias)
    sent = jnp.dot(att_s.astype(jnp.bfloat16),
                   hout[:, 0:nclass].astype(jnp.bfloat16),
                   preferred_element_type=jnp.float32)               # (N, nclass)
    sent_ref[0] = (1.0 / (1.0 + jnp.exp(-sent))).astype(sent_ref.dtype)

    # para: elu(att @ h_para)
    e_p = _leaky_relu(fout[:, 1:2] + f2o[1:2, :], alpha)
    att_p = _masked_softmax(e_p, bias)
    para = jnp.dot(att_p.astype(jnp.bfloat16),
                   hout[:, nclass:2 * nclass].astype(jnp.bfloat16),
                   preferred_element_type=jnp.float32)               # (N, nclass)
    para_ref[0] = _elu(para).astype(para_ref.dtype)

    # Qtype: only row 0 of the attention output is used ([:, 0, :] @ W2).
    e_q0 = _leaky_relu(fout[0:1, 2:3] + f2o[2:3, :], alpha)          # (1, N)
    att_q0 = _masked_softmax(e_q0, bias[0:1, :])                     # (1, N)
    q0 = jnp.dot(att_q0.astype(jnp.bfloat16),
                 hout[:, 2 * nclass:].astype(jnp.bfloat16),
                 preferred_element_type=jnp.float32)                 # (1, hidden)
    qt = jnp.dot(q0.astype(jnp.bfloat16), w2_ref[...],
                 preferred_element_type=jnp.float32)                 # (1, 2)
    qtype_ref[0] = _elu(qt).astype(qtype_ref.dtype)


# ---------------------------------------------------------------------------
# Parameter construction (xavier-uniform, like the PyTorch init)
# ---------------------------------------------------------------------------
def _xavier_uniform(key, shape, gain=1.414):
    fan_in, fan_out = shape[0], shape[1]
    bound = gain * (6.0 / (fan_in + fan_out)) ** 0.5
    return jax.random.uniform(key, shape, jnp.float32, -bound, bound)


def init_gat_hotpotqa_params(key, *, features, hidden, nclass, nheads, nodes_num):
    keys = jax.random.split(key, 2 * nheads + 7)
    params = {"attentions": []}
    for i in range(nheads):
        W = _xavier_uniform(keys[2 * i], (features, hidden))
        a = _xavier_uniform(keys[2 * i + 1], (2 * hidden, 1))
        params["attentions"].append((W, a))
    k = 2 * nheads
    params["out_sent"] = (_xavier_uniform(keys[k + 0], (hidden * nheads, nclass)),
                          _xavier_uniform(keys[k + 1], (2 * nclass, 1)))
    params["out_para"] = (_xavier_uniform(keys[k + 2], (hidden * nheads, nclass)),
                          _xavier_uniform(keys[k + 3], (2 * nclass, 1)))
    params["out_qtype"] = (_xavier_uniform(keys[k + 4], (hidden * nheads, hidden)),
                           _xavier_uniform(keys[k + 5], (2 * hidden, 1)))
    params["W2"] = _xavier_uniform(keys[k + 6], (hidden, 2))
    # BatchNorm1d(nodes_num) eval-mode state (freshly initialised model).
    # TODO(synk): a trained model would carry non-trivial running stats here.
    params["bn_gamma"] = jnp.ones((nodes_num,), jnp.float32)
    params["bn_beta"] = jnp.zeros((nodes_num,), jnp.float32)
    params["bn_running_mean"] = jnp.zeros((nodes_num,), jnp.float32)
    params["bn_running_var"] = jnp.ones((nodes_num,), jnp.float32)
    return params


# ---------------------------------------------------------------------------
# GAT_HotpotQA forward (inference mode)
# ---------------------------------------------------------------------------
def gat_hotpotqa_forward(params, feat_matrix, adj, *, alpha=0.3, bn_eps=1e-5):
    B, N, F = feat_matrix.shape
    attentions = params["attentions"]
    nheads = len(attentions)
    hidden = attentions[0][0].shape[1]
    C = nheads * hidden
    nclass = params["out_sent"][0].shape[1]
    Ktot = 2 * nclass + hidden

    # TODO(synk): F.dropout is stochastic; inference mode -> identity.
    # Adjacency streamed as int8 mask (bias built in-kernel): 4x fewer HBM bytes.
    adj_mask = (adj > 0).astype(jnp.int8)                            # (B, N, N)

    # Pack all input heads: stacked W and block-diagonal [a1 | a2].
    W_all = jnp.concatenate([W for W, _ in attentions], axis=1)      # (F, C)
    A_all = jnp.zeros((C, 2 * nheads), jnp.float32)
    for i, (_, a) in enumerate(attentions):
        A_all = A_all.at[i * hidden:(i + 1) * hidden, i].set(a[:hidden, 0])
        A_all = A_all.at[i * hidden:(i + 1) * hidden, nheads + i].set(a[hidden:, 0])

    # Merge the three output layers: one projection weight + block-diag a's.
    W_s, a_s = params["out_sent"]
    W_p, a_p = params["out_para"]
    W_q, a_q = params["out_qtype"]
    W_out = jnp.concatenate([W_s, W_p, W_q], axis=1)                 # (C, Ktot)
    A_out = jnp.zeros((Ktot, 6), jnp.float32)
    A_out = A_out.at[0:nclass, 0].set(a_s[:nclass, 0])
    A_out = A_out.at[0:nclass, 3].set(a_s[nclass:, 0])
    A_out = A_out.at[nclass:2 * nclass, 1].set(a_p[:nclass, 0])
    A_out = A_out.at[nclass:2 * nclass, 4].set(a_p[nclass:, 0])
    A_out = A_out.at[2 * nclass:, 2].set(a_q[:hidden, 0])
    A_out = A_out.at[2 * nclass:, 5].set(a_q[hidden:, 0])

    # bf16 weights: half the streamed bytes, native MXU path (f32 accumulate).
    W_all = W_all.astype(jnp.bfloat16)
    A_all = A_all.astype(jnp.bfloat16)
    W_out = W_out.astype(jnp.bfloat16)
    A_out = A_out.astype(jnp.bfloat16)
    W2 = params["W2"].astype(jnp.bfloat16)

    # Fold eval-mode BatchNorm1d(nodes_num) into a per-node affine.
    inv_std = 1.0 / jnp.sqrt(params["bn_running_var"] + bn_eps)
    scale = params["bn_gamma"] * inv_std                             # (N,)
    shift = params["bn_beta"] - params["bn_running_mean"] * scale    # (N,)
    bn_scale = scale[:, None].astype(jnp.float32)                    # (N, 1)
    bn_shift = shift[:, None].astype(jnp.float32)                    # (N, 1)

    flops_per_b = (2 * N * F * C + 2 * N * C * (2 * nheads)
                   + nheads * (8 * N * N + 2 * N * N * hidden) + 4 * N * C
                   + 2 * N * C + 2 * N * C * Ktot + 2 * N * Ktot * 6
                   + 24 * N * N + 4 * N * N * nclass + 2 * N * hidden + 4 * hidden)
    cost = pl.CostEstimate(
        flops=B * flops_per_b,
        transcendentals=B * ((nheads + 3) * N * N + 2 * N * C + 2 * N * nclass + 2),
        bytes_accessed=(B * N * N + 4 * B * N * F + 8 * N
                        + 2 * (F * C + C * 2 * nheads + C * Ktot + Ktot * 6 + hidden * 2)
                        + 4 * (2 * B * N * nclass + 2 * B)))

    sent, para, qtype3 = pl.pallas_call(
        functools.partial(_gat_fused_kernel, alpha=alpha, nheads=nheads,
                          hidden=hidden, nclass=nclass),
        grid=(B,),
        out_shape=(jax.ShapeDtypeStruct((B, N, nclass), jnp.float32),
                   jax.ShapeDtypeStruct((B, N, nclass), jnp.float32),
                   jax.ShapeDtypeStruct((B, 1, 2), jnp.float32)),
        in_specs=[
            pl.BlockSpec((1, N, N), lambda b: (b, 0, 0)),      # adj mask (int8)
            pl.BlockSpec((1, N, F), lambda b: (b, 0, 0)),      # features
            pl.BlockSpec((F, C), lambda b: (0, 0)),            # W_all
            pl.BlockSpec((C, 2 * nheads), lambda b: (0, 0)),   # A_all
            pl.BlockSpec((N, 1), lambda b: (0, 0)),            # bn_scale
            pl.BlockSpec((N, 1), lambda b: (0, 0)),            # bn_shift
            pl.BlockSpec((C, Ktot), lambda b: (0, 0)),         # W_out
            pl.BlockSpec((Ktot, 6), lambda b: (0, 0)),         # A_out
            pl.BlockSpec((hidden, 2), lambda b: (0, 0)),       # W2
        ],
        out_specs=(
            pl.BlockSpec((1, N, nclass), lambda b: (b, 0, 0)),
            pl.BlockSpec((1, N, nclass), lambda b: (b, 0, 0)),
            pl.BlockSpec((1, 1, 2), lambda b: (b, 0, 0)),
        ),
        compiler_params=pltpu.CompilerParams(
            dimension_semantics=("parallel",),        # megacore / v7x 2-TC sharding
            vmem_limit_bytes=48 * 1024 * 1024),       # headroom; fits v7x's 64 MiB
        cost_estimate=cost,
    )(adj_mask, feat_matrix, W_all, A_all, bn_scale, bn_shift, W_out, A_out, W2)

    return sent, para, qtype3.reshape(B, 2)


# ---------------------------------------------------------------------------
if __name__ == "__main__":
    # Small shapes consistent with the module's forward.
    B, N = 2, 16           # batch, nodes_num
    FEATURES = 64          # input feature dim (768 in the original)
    HIDDEN = 32
    NCLASS = 2
    NHEADS = 4             # HIDDEN * NHEADS = 128 -> lane-dense fused activation
    ALPHA = 0.3

    key = jax.random.PRNGKey(0)
    k_feat, k_adj, k_params = jax.random.split(key, 3)

    feat_matrix = jax.random.normal(k_feat, (B, N, FEATURES), jnp.float32)
    # Binary adjacency with self loops so no row is fully masked.
    rand = jax.random.uniform(k_adj, (B, N, N))
    adj = ((rand > 0.5) | jnp.eye(N, dtype=bool)[None]).astype(jnp.float32)

    params = init_gat_hotpotqa_params(
        k_params, features=FEATURES, hidden=HIDDEN, nclass=NCLASS,
        nheads=NHEADS, nodes_num=N)

    fwd = jax.jit(functools.partial(gat_hotpotqa_forward, alpha=ALPHA))
    logits_sent, logits_para, logits_qtype = fwd(params, feat_matrix, adj)
    jax.block_until_ready((logits_sent, logits_para, logits_qtype))

    assert logits_sent.shape == (B, N, NCLASS)
    assert logits_para.shape == (B, N, NCLASS)
    assert logits_qtype.shape == (B, 2)
    assert not bool(jnp.isnan(logits_sent).any())
    assert not bool(jnp.isnan(logits_para).any())
    assert not bool(jnp.isnan(logits_qtype).any())
    assert bool(((logits_sent >= 0.0) & (logits_sent <= 1.0)).all())  # sigmoid range

    print("KERNEL_OK")
</pallas_src>

<mosaic_0001>
module attributes {stable_mosaic.version = 11 : i64} {
  func.func @_gat_fused_kernel(%arg0: i32, %arg1: memref<1x16x16xi8, #tpu.memory_space<vmem>>, %arg2: memref<1x16x64xf32, #tpu.memory_space<vmem>>, %arg3: memref<64x128xbf16, #tpu.memory_space<vmem>>, %arg4: memref<128x8xbf16, #tpu.memory_space<vmem>>, %arg5: memref<16x1xf32, #tpu.memory_space<vmem>>, %arg6: memref<16x1xf32, #tpu.memory_space<vmem>>, %arg7: memref<128x36xbf16, #tpu.memory_space<vmem>>, %arg8: memref<36x6xbf16, #tpu.memory_space<vmem>>, %arg9: memref<32x2xbf16, #tpu.memory_space<vmem>>, %arg10: memref<1x16x2xf32, #tpu.memory_space<vmem>>, %arg11: memref<1x16x2xf32, #tpu.memory_space<vmem>>, %arg12: memref<1x1x2xf32, #tpu.memory_space<vmem>>) attributes {dimension_semantics = [#tpu.dimension_semantics<parallel>], iteration_bounds = array<i64: 2>, scalar_prefetch = 0 : i64, scratch_operands = 0 : i64, tpu.core_type = #tpu.core_type<tc>, window_params = [{transform_indices = @transform_0, window_bounds = array<i64: 1, 16, 16>}, {transform_indices = @transform_1, window_bounds = array<i64: 1, 16, 64>}, {pipeline_mode = #tpu.pipeline_mode<synchronous>, transform_indices = @transform_2, window_bounds = array<i64: 64, 128>}, {pipeline_mode = #tpu.pipeline_mode<synchronous>, transform_indices = @transform_3, window_bounds = array<i64: 128, 8>}, {pipeline_mode = #tpu.pipeline_mode<synchronous>, transform_indices = @transform_4, window_bounds = array<i64: 16, 1>}, {pipeline_mode = #tpu.pipeline_mode<synchronous>, transform_indices = @transform_5, window_bounds = array<i64: 16, 1>}, {pipeline_mode = #tpu.pipeline_mode<synchronous>, transform_indices = @transform_6, window_bounds = array<i64: 128, 36>}, {pipeline_mode = #tpu.pipeline_mode<synchronous>, transform_indices = @transform_7, window_bounds = array<i64: 36, 6>}, {pipeline_mode = #tpu.pipeline_mode<synchronous>, transform_indices = @transform_8, window_bounds = array<i64: 32, 2>}, {transform_indices = @transform_9, window_bounds = array<i64: 1, 16, 2>}, {transform_indices = @transform_10, window_bounds = array<i64: 1, 16, 2>}, {transform_indices = @transform_11, window_bounds = array<i64: 1, 1, 2>}]} {
    %c0 = arith.constant 0 : index
    %c0_0 = arith.constant 0 : index
    %c0_1 = arith.constant 0 : index
    %0 = vector.load %arg1[%c0, %c0_0, %c0_1] : memref<1x16x16xi8, #tpu.memory_space<vmem>>, vector<1x16x16xi8>
    %1 = vector.shape_cast %0 : vector<1x16x16xi8> to vector<16x16xi8>
    %2 = arith.sitofp %1 : vector<16x16xi8> to vector<16x16xf32>
    %cst = arith.constant 0.000000e+00 : f32
    %3 = vector.broadcast %cst : f32 to vector<16x16xf32>
    %4 = arith.cmpf ogt, %2, %3 : vector<16x16xf32>
    %cst_2 = arith.constant 0.000000e+00 : f32
    %cst_3 = arith.constant -9.000000e+15 : f32
    %5 = vector.broadcast %cst_2 : f32 to vector<16x16xf32>
    %6 = vector.broadcast %cst_3 : f32 to vector<16x16xf32>
    %7 = arith.select %4, %5, %6 : vector<16x16xi1>, vector<16x16xf32>
    %c0_4 = arith.constant 0 : index
    %c0_5 = arith.constant 0 : index
    %c0_6 = arith.constant 0 : index
    %8 = vector.load %arg2[%c0_4, %c0_5, %c0_6] : memref<1x16x64xf32, #tpu.memory_space<vmem>>, vector<1x16x64xf32>
    %9 = vector.shape_cast %8 : vector<1x16x64xf32> to vector<16x64xf32>
    %10 = arith.truncf %9 : vector<16x64xf32> to vector<16x64xbf16>
    %c0_7 = arith.constant 0 : index
    %c0_8 = arith.constant 0 : index
    %11 = vector.load %arg3[%c0_7, %c0_8] : memref<64x128xbf16, #tpu.memory_space<vmem>>, vector<64x128xbf16>
    %cst_9 = arith.constant dense<0.000000e+00> : vector<16x128xf32>
    %12 = tpu.matmul %10, %11, %cst_9 {dimension_numbers = #tpu.dot_dimension_numbers<[1], [0], [0], [1], [0, 0, 1, 1], [], []>} : vector<16x64xbf16>, vector<64x128xbf16>, vector<16x128xf32> -> vector<16x128xf32>
    %13 = arith.truncf %12 : vector<16x128xf32> to vector<16x128xbf16>
    %c0_10 = arith.constant 0 : index
    %c0_11 = arith.constant 0 : index
    %14 = vector.load %arg4[%c0_10, %c0_11] : memref<128x8xbf16, #tpu.memory_space<vmem>>, vector<128x8xbf16>
    %cst_12 = arith.constant dense<0.000000e+00> : vector<16x8xf32>
    %15 = tpu.matmul %13, %14, %cst_12 {dimension_numbers = #tpu.dot_dimension_numbers<[1], [0], [0], [1], [0, 0, 1, 1], [], []>} : vector<16x128xbf16>, vector<128x8xbf16>, vector<16x8xf32> -> vector<16x8xf32>
    %16 = vector.extract_strided_slice %15 {offsets = [0, 4], sizes = [16, 4], strides = [1, 1]} : vector<16x8xf32> to vector<16x4xf32>
    %17 = tpu.transpose %16, [1, 0] : vector<16x4xf32> -> vector<4x16xf32>
    %18 = vector.extract_strided_slice %15 {offsets = [0, 0], sizes = [16, 1], strides = [1, 1]} : vector<16x8xf32> to vector<16x1xf32>
    %19 = vector.extract_strided_slice %17 {offsets = [0, 0], sizes = [1, 16], strides = [1, 1]} : vector<4x16xf32> to vector<1x16xf32>
    %20 = vector.broadcast %18 : vector<16x1xf32> to vector<16x16xf32>
    %21 = vector.broadcast %19 : vector<1x16xf32> to vector<16x16xf32>
    %22 = arith.addf %20, %21 : vector<16x16xf32>
    %cst_13 = arith.constant 0.000000e+00 : f32
    %23 = vector.broadcast %cst_13 : f32 to vector<16x16xf32>
    %24 = arith.cmpf ogt, %22, %23 : vector<16x16xf32>
    %cst_14 = arith.constant 3.000000e-01 : f32
    %25 = vector.broadcast %cst_14 : f32 to vector<16x16xf32>
    %26 = arith.mulf %25, %22 : vector<16x16xf32>
    %27 = arith.select %24, %22, %26 : vector<16x16xi1>, vector<16x16xf32>
    %28 = arith.addf %27, %7 : vector<16x16xf32>
    %cst_15 = arith.constant dense<0xFF800000> : vector<16xf32>
    %29 = vector.multi_reduction <maximumf>, %28, %cst_15 [1] : vector<16x16xf32> to vector<16xf32>
    %30 = vector.shape_cast %29 : vector<16xf32> to vector<16x1xf32>
    %31 = vector.broadcast %30 : vector<16x1xf32> to vector<16x16xf32>
    %32 = arith.subf %28, %31 : vector<16x16xf32>
    %33 = math.exp %32 : vector<16x16xf32>
    %cst_16 = arith.constant dense<0.000000e+00> : vector<16xf32>
    %34 = vector.multi_reduction <add>, %33, %cst_16 [1] : vector<16x16xf32> to vector<16xf32>
    %35 = vector.shape_cast %34 : vector<16xf32> to vector<16x1xf32>
    %36 = tpu.reciprocal %35 {approx = true} : vector<16x1xf32> -> vector<16x1xf32>
    %37 = vector.broadcast %36 : vector<16x1xf32> to vector<16x16xf32>
    %38 = arith.mulf %33, %37 : vector<16x16xf32>
    %39 = vector.extract_strided_slice %13 {offsets = [0, 0], sizes = [16, 32], strides = [1, 1]} : vector<16x128xbf16> to vector<16x32xbf16>
    %40 = arith.truncf %38 : vector<16x16xf32> to vector<16x16xbf16>
    %cst_17 = arith.constant dense<0.000000e+00> : vector<16x32xf32>
    %41 = tpu.matmul %40, %39, %cst_17 {dimension_numbers = #tpu.dot_dimension_numbers<[1], [0], [0], [1], [0, 0, 1, 1], [], []>} : vector<16x16xbf16>, vector<16x32xbf16>, vector<16x32xf32> -> vector<16x32xf32>
    %cst_18 = arith.constant 0.000000e+00 : f32
    %42 = vector.broadcast %cst_18 : f32 to vector<16x32xf32>
    %43 = arith.cmpf ogt, %41, %42 : vector<16x32xf32>
    %cst_19 = arith.constant 0.000000e+00 : f32
    %44 = vector.broadcast %cst_19 : f32 to vector<16x32xf32>
    %45 = arith.minimumf %41, %44 : vector<16x32xf32>
    %46 = math.exp %45 : vector<16x32xf32>
    %cst_20 = arith.constant 1.000000e+00 : f32
    %47 = vector.broadcast %cst_20 : f32 to vector<16x32xf32>
    %48 = arith.subf %46, %47 : vector<16x32xf32>
    %49 = arith.select %43, %41, %48 : vector<16x32xi1>, vector<16x32xf32>
    %50 = vector.extract_strided_slice %15 {offsets = [0, 1], sizes = [16, 1], strides = [1, 1]} : vector<16x8xf32> to vector<16x1xf32>
    %51 = vector.extract_strided_slice %17 {offsets = [1, 0], sizes = [1, 16], strides = [1, 1]} : vector<4x16xf32> to vector<1x16xf32>
    %52 = vector.broadcast %50 : vector<16x1xf32> to vector<16x16xf32>
    %53 = vector.broadcast %51 : vector<1x16xf32> to vector<16x16xf32>
    %54 = arith.addf %52, %53 : vector<16x16xf32>
    %cst_21 = arith.constant 0.000000e+00 : f32
    %55 = vector.broadcast %cst_21 : f32 to vector<16x16xf32>
    %56 = arith.cmpf ogt, %54, %55 : vector<16x16xf32>
    %cst_22 = arith.constant 3.000000e-01 : f32
    %57 = vector.broadcast %cst_22 : f32 to vector<16x16xf32>
    %58 = arith.mulf %57, %54 : vector<16x16xf32>
    %59 = arith.select %56, %54, %58 : vector<16x16xi1>, vector<16x16xf32>
    %60 = arith.addf %59, %7 : vector<16x16xf32>
    %cst_23 = arith.constant dense<0xFF800000> : vector<16xf32>
    %61 = vector.multi_reduction <maximumf>, %60, %cst_23 [1] : vector<16x16xf32> to vector<16xf32>
    %62 = vector.shape_cast %61 : vector<16xf32> to vector<16x1xf32>
    %63 = vector.broadcast %62 : vector<16x1xf32> to vector<16x16xf32>
    %64 = arith.subf %60, %63 : vector<16x16xf32>
    %65 = math.exp %64 : vector<16x16xf32>
    %cst_24 = arith.constant dense<0.000000e+00> : vector<16xf32>
    %66 = vector.multi_reduction <add>, %65, %cst_24 [1] : vector<16x16xf32> to vector<16xf32>
    %67 = vector.shape_cast %66 : vector<16xf32> to vector<16x1xf32>
    %68 = tpu.reciprocal %67 {approx = true} : vector<16x1xf32> -> vector<16x1xf32>
    %69 = vector.broadcast %68 : vector<16x1xf32> to vector<16x16xf32>
    %70 = arith.mulf %65, %69 : vector<16x16xf32>
    %71 = vector.extract_strided_slice %13 {offsets = [0, 32], sizes = [16, 32], strides = [1, 1]} : vector<16x128xbf16> to vector<16x32xbf16>
    %72 = arith.truncf %70 : vector<16x16xf32> to vector<16x16xbf16>
    %cst_25 = arith.constant dense<0.000000e+00> : vector<16x32xf32>
    %73 = tpu.matmul %72, %71, %cst_25 {dimension_numbers = #tpu.dot_dimension_numbers<[1], [0], [0], [1], [0, 0, 1, 1], [], []>} : vector<16x16xbf16>, vector<16x32xbf16>, vector<16x32xf32> -> vector<16x32xf32>
    %cst_26 = arith.constant 0.000000e+00 : f32
    %74 = vector.broadcast %cst_26 : f32 to vector<16x32xf32>
    %75 = arith.cmpf ogt, %73, %74 : vector<16x32xf32>
    %cst_27 = arith.constant 0.000000e+00 : f32
    %76 = vector.broadcast %cst_27 : f32 to vector<16x32xf32>
    %77 = arith.minimumf %73, %76 : vector<16x32xf32>
    %78 = math.exp %77 : vector<16x32xf32>
    %cst_28 = arith.constant 1.000000e+00 : f32
    %79 = vector.broadcast %cst_28 : f32 to vector<16x32xf32>
    %80 = arith.subf %78, %79 : vector<16x32xf32>
    %81 = arith.select %75, %73, %80 : vector<16x32xi1>, vector<16x32xf32>
    %82 = vector.extract_strided_slice %15 {offsets = [0, 2], sizes = [16, 1], strides = [1, 1]} : vector<16x8xf32> to vector<16x1xf32>
    %83 = vector.extract_strided_slice %17 {offsets = [2, 0], sizes = [1, 16], strides = [1, 1]} : vector<4x16xf32> to vector<1x16xf32>
    %84 = vector.broadcast %82 : vector<16x1xf32> to vector<16x16xf32>
    %85 = vector.broadcast %83 : vector<1x16xf32> to vector<16x16xf32>
    %86 = arith.addf %84, %85 : vector<16x16xf32>
    %cst_29 = arith.constant 0.000000e+00 : f32
    %87 = vector.broadcast %cst_29 : f32 to vector<16x16xf32>
    %88 = arith.cmpf ogt, %86, %87 : vector<16x16xf32>
    %cst_30 = arith.constant 3.000000e-01 : f32
    %89 = vector.broadcast %cst_30 : f32 to vector<16x16xf32>
    %90 = arith.mulf %89, %86 : vector<16x16xf32>
    %91 = arith.select %88, %86, %90 : vector<16x16xi1>, vector<16x16xf32>
    %92 = arith.addf %91, %7 : vector<16x16xf32>
    %cst_31 = arith.constant dense<0xFF800000> : vector<16xf32>
    %93 = vector.multi_reduction <maximumf>, %92, %cst_31 [1] : vector<16x16xf32> to vector<16xf32>
    %94 = vector.shape_cast %93 : vector<16xf32> to vector<16x1xf32>
    %95 = vector.broadcast %94 : vector<16x1xf32> to vector<16x16xf32>
    %96 = arith.subf %92, %95 : vector<16x16xf32>
    %97 = math.exp %96 : vector<16x16xf32>
    %cst_32 = arith.constant dense<0.000000e+00> : vector<16xf32>
    %98 = vector.multi_reduction <add>, %97, %cst_32 [1] : vector<16x16xf32> to vector<16xf32>
    %99 = vector.shape_cast %98 : vector<16xf32> to vector<16x1xf32>
    %100 = tpu.reciprocal %99 {approx = true} : vector<16x1xf32> -> vector<16x1xf32>
    %101 = vector.broadcast %100 : vector<16x1xf32> to vector<16x16xf32>
    %102 = arith.mulf %97, %101 : vector<16x16xf32>
    %103 = vector.extract_strided_slice %13 {offsets = [0, 64], sizes = [16, 32], strides = [1, 1]} : vector<16x128xbf16> to vector<16x32xbf16>
    %104 = arith.truncf %102 : vector<16x16xf32> to vector<16x16xbf16>
    %cst_33 = arith.constant dense<0.000000e+00> : vector<16x32xf32>
    %105 = tpu.matmul %104, %103, %cst_33 {dimension_numbers = #tpu.dot_dimension_numbers<[1], [0], [0], [1], [0, 0, 1, 1], [], []>} : vector<16x16xbf16>, vector<16x32xbf16>, vector<16x32xf32> -> vector<16x32xf32>
    %cst_34 = arith.constant 0.000000e+00 : f32
    %106 = vector.broadcast %cst_34 : f32 to vector<16x32xf32>
    %107 = arith.cmpf ogt, %105, %106 : vector<16x32xf32>
    %cst_35 = arith.constant 0.000000e+00 : f32
    %108 = vector.broadcast %cst_35 : f32 to vector<16x32xf32>
    %109 = arith.minimumf %105, %108 : vector<16x32xf32>
    %110 = math.exp %109 : vector<16x32xf32>
    %cst_36 = arith.constant 1.000000e+00 : f32
    %111 = vector.broadcast %cst_36 : f32 to vector<16x32xf32>
    %112 = arith.subf %110, %111 : vector<16x32xf32>
    %113 = arith.select %107, %105, %112 : vector<16x32xi1>, vector<16x32xf32>
    %114 = vector.extract_strided_slice %15 {offsets = [0, 3], sizes = [16, 1], strides = [1, 1]} : vector<16x8xf32> to vector<16x1xf32>
    %115 = vector.extract_strided_slice %17 {offsets = [3, 0], sizes = [1, 16], strides = [1, 1]} : vector<4x16xf32> to vector<1x16xf32>
    %116 = vector.broadcast %114 : vector<16x1xf32> to vector<16x16xf32>
    %117 = vector.broadcast %115 : vector<1x16xf32> to vector<16x16xf32>
    %118 = arith.addf %116, %117 : vector<16x16xf32>
    %cst_37 = arith.constant 0.000000e+00 : f32
    %119 = vector.broadcast %cst_37 : f32 to vector<16x16xf32>
    %120 = arith.cmpf ogt, %118, %119 : vector<16x16xf32>
    %cst_38 = arith.constant 3.000000e-01 : f32
    %121 = vector.broadcast %cst_38 : f32 to vector<16x16xf32>
    %122 = arith.mulf %121, %118 : vector<16x16xf32>
    %123 = arith.select %120, %118, %122 : vector<16x16xi1>, vector<16x16xf32>
    %124 = arith.addf %123, %7 : vector<16x16xf32>
    %cst_39 = arith.constant dense<0xFF800000> : vector<16xf32>
    %125 = vector.multi_reduction <maximumf>, %124, %cst_39 [1] : vector<16x16xf32> to vector<16xf32>
    %126 = vector.shape_cast %125 : vector<16xf32> to vector<16x1xf32>
    %127 = vector.broadcast %126 : vector<16x1xf32> to vector<16x16xf32>
    %128 = arith.subf %124, %127 : vector<16x16xf32>
    %129 = math.exp %128 : vector<16x16xf32>
    %cst_40 = arith.constant dense<0.000000e+00> : vector<16xf32>
    %130 = vector.multi_reduction <add>, %129, %cst_40 [1] : vector<16x16xf32> to vector<16xf32>
    %131 = vector.shape_cast %130 : vector<16xf32> to vector<16x1xf32>
    %132 = tpu.reciprocal %131 {approx = true} : vector<16x1xf32> -> vector<16x1xf32>
    %133 = vector.broadcast %132 : vector<16x1xf32> to vector<16x16xf32>
    %134 = arith.mulf %129, %133 : vector<16x16xf32>
    %135 = vector.extract_strided_slice %13 {offsets = [0, 96], sizes = [16, 32], strides = [1, 1]} : vector<16x128xbf16> to vector<16x32xbf16>
    %136 = arith.truncf %134 : vector<16x16xf32> to vector<16x16xbf16>
    %cst_41 = arith.constant dense<0.000000e+00> : vector<16x32xf32>
    %137 = tpu.matmul %136, %135, %cst_41 {dimension_numbers = #tpu.dot_dimension_numbers<[1], [0], [0], [1], [0, 0, 1, 1], [], []>} : vector<16x16xbf16>, vector<16x32xbf16>, vector<16x32xf32> -> vector<16x32xf32>
    %cst_42 = arith.constant 0.000000e+00 : f32
    %138 = vector.broadcast %cst_42 : f32 to vector<16x32xf32>
    %139 = arith.cmpf ogt, %137, %138 : vector<16x32xf32>
    %cst_43 = arith.constant 0.000000e+00 : f32
    %140 = vector.broadcast %cst_43 : f32 to vector<16x32xf32>
    %141 = arith.minimumf %137, %140 : vector<16x32xf32>
    %142 = math.exp %141 : vector<16x32xf32>
    %cst_44 = arith.constant 1.000000e+00 : f32
    %143 = vector.broadcast %cst_44 : f32 to vector<16x32xf32>
    %144 = arith.subf %142, %143 : vector<16x32xf32>
    %145 = arith.select %139, %137, %144 : vector<16x32xi1>, vector<16x32xf32>
    %146 = tpu.concatenate %49, %81, %113, %145 in 1 : vector<16x32xf32>, vector<16x32xf32>, vector<16x32xf32>, vector<16x32xf32> -> vector<16x128xf32>
    %c0_45 = arith.constant 0 : index
    %c0_46 = arith.constant 0 : index
    %147 = vector.load %arg5[%c0_45, %c0_46] : memref<16x1xf32, #tpu.memory_space<vmem>>, vector<16x1xf32>
    %148 = vector.broadcast %147 : vector<16x1xf32> to vector<16x128xf32>
    %149 = arith.mulf %146, %148 : vector<16x128xf32>
    %c0_47 = arith.constant 0 : index
    %c0_48 = arith.constant 0 : index
    %150 = vector.load %arg6[%c0_47, %c0_48] : memref<16x1xf32, #tpu.memory_space<vmem>>, vector<16x1xf32>
    %151 = vector.broadcast %150 : vector<16x1xf32> to vector<16x128xf32>
    %152 = arith.addf %149, %151 : vector<16x128xf32>
    %153 = arith.truncf %152 : vector<16x128xf32> to vector<16x128xbf16>
    %c0_49 = arith.constant 0 : index
    %c0_50 = arith.constant 0 : index
    %154 = vector.load %arg7[%c0_49, %c0_50] : memref<128x36xbf16, #tpu.memory_space<vmem>>, vector<128x36xbf16>
    %cst_51 = arith.constant dense<0.000000e+00> : vector<16x36xf32>
    %155 = tpu.matmul %153, %154, %cst_51 {dimension_numbers = #tpu.dot_dimension_numbers<[1], [0], [0], [1], [0, 0, 1, 1], [], []>} : vector<16x128xbf16>, vector<128x36xbf16>, vector<16x36xf32> -> vector<16x36xf32>
    %156 = arith.truncf %155 : vector<16x36xf32> to vector<16x36xbf16>
    %c0_52 = arith.constant 0 : index
    %c0_53 = arith.constant 0 : index
    %157 = vector.load %arg8[%c0_52, %c0_53] : memref<36x6xbf16, #tpu.memory_space<vmem>>, vector<36x6xbf16>
    %cst_54 = arith.constant dense<0.000000e+00> : vector<16x6xf32>
    %158 = tpu.matmul %156, %157, %cst_54 {dimension_numbers = #tpu.dot_dimension_numbers<[1], [0], [0], [1], [0, 0, 1, 1], [], []>} : vector<16x36xbf16>, vector<36x6xbf16>, vector<16x6xf32> -> vector<16x6xf32>
    %159 = vector.extract_strided_slice %158 {offsets = [0, 3], sizes = [16, 3], strides = [1, 1]} : vector<16x6xf32> to vector<16x3xf32>
    %160 = tpu.transpose %159, [1, 0] : vector<16x3xf32> -> vector<3x16xf32>
    %161 = vector.extract_strided_slice %158 {offsets = [0, 0], sizes = [16, 1], strides = [1, 1]} : vector<16x6xf32> to vector<16x1xf32>
    %162 = vector.extract_strided_slice %160 {offsets = [0, 0], sizes = [1, 16], strides = [1, 1]} : vector<3x16xf32> to vector<1x16xf32>
    %163 = vector.broadcast %161 : vector<16x1xf32> to vector<16x16xf32>
    %164 = vector.broadcast %162 : vector<1x16xf32> to vector<16x16xf32>
    %165 = arith.addf %163, %164 : vector<16x16xf32>
    %cst_55 = arith.constant 0.000000e+00 : f32
    %166 = vector.broadcast %cst_55 : f32 to vector<16x16xf32>
    %167 = arith.cmpf ogt, %165, %166 : vector<16x16xf32>
    %cst_56 = arith.constant 3.000000e-01 : f32
    %168 = vector.broadcast %cst_56 : f32 to vector<16x16xf32>
    %169 = arith.mulf %168, %165 : vector<16x16xf32>
    %170 = arith.select %167, %165, %169 : vector<16x16xi1>, vector<16x16xf32>
    %171 = arith.addf %170, %7 : vector<16x16xf32>
    %cst_57 = arith.constant dense<0xFF800000> : vector<16xf32>
    %172 = vector.multi_reduction <maximumf>, %171, %cst_57 [1] : vector<16x16xf32> to vector<16xf32>
    %173 = vector.shape_cast %172 : vector<16xf32> to vector<16x1xf32>
    %174 = vector.broadcast %173 : vector<16x1xf32> to vector<16x16xf32>
    %175 = arith.subf %171, %174 : vector<16x16xf32>
    %176 = math.exp %175 : vector<16x16xf32>
    %cst_58 = arith.constant dense<0.000000e+00> : vector<16xf32>
    %177 = vector.multi_reduction <add>, %176, %cst_58 [1] : vector<16x16xf32> to vector<16xf32>
    %178 = vector.shape_cast %177 : vector<16xf32> to vector<16x1xf32>
    %179 = tpu.reciprocal %178 {approx = true} : vector<16x1xf32> -> vector<16x1xf32>
    %180 = vector.broadcast %179 : vector<16x1xf32> to vector<16x16xf32>
    %181 = arith.mulf %176, %180 : vector<16x16xf32>
    %182 = arith.truncf %181 : vector<16x16xf32> to vector<16x16xbf16>
    %183 = vector.extract_strided_slice %155 {offsets = [0, 0], sizes = [16, 2], strides = [1, 1]} : vector<16x36xf32> to vector<16x2xf32>
    %184 = arith.truncf %183 : vector<16x2xf32> to vector<16x2xbf16>
    %cst_59 = arith.constant dense<0.000000e+00> : vector<16x2xf32>
    %185 = tpu.matmul %182, %184, %cst_59 {dimension_numbers = #tpu.dot_dimension_numbers<[1], [0], [0], [1], [0, 0, 1, 1], [], []>} : vector<16x16xbf16>, vector<16x2xbf16>, vector<16x2xf32> -> vector<16x2xf32>
    %cst_60 = arith.constant 0.000000e+00 : f32
    %186 = vector.broadcast %cst_60 : f32 to vector<16x2xf32>
    %187 = arith.subf %186, %185 : vector<16x2xf32>
    %188 = math.exp %187 : vector<16x2xf32>
    %cst_61 = arith.constant 1.000000e+00 : f32
    %189 = vector.broadcast %cst_61 : f32 to vector<16x2xf32>
    %190 = arith.addf %189, %188 : vector<16x2xf32>
    %cst_62 = arith.constant 1.000000e+00 : f32
    %191 = vector.broadcast %cst_62 : f32 to vector<16x2xf32>
    %192 = arith.divf %191, %190 : vector<16x2xf32>
    %c0_63 = arith.constant 0 : index
    %c0_64 = arith.constant 0 : index
    %c0_65 = arith.constant 0 : index
    %193 = vector.load %arg10[%c0_63, %c0_64, %c0_65] : memref<1x16x2xf32, #tpu.memory_space<vmem>>, vector<1x16x2xf32>
    %194 = vector.shape_cast %193 : vector<1x16x2xf32> to vector<16x2xf32>
    %195 = vector.shape_cast %192 : vector<16x2xf32> to vector<1x16x2xf32>
    tpu.vector_store %arg10[%c0_63, %c0_64, %c0_65], %195 {strides = array<i32>} : memref<1x16x2xf32, #tpu.memory_space<vmem>>, vector<1x16x2xf32>,
    %196 = vector.extract_strided_slice %158 {offsets = [0, 1], sizes = [16, 1], strides = [1, 1]} : vector<16x6xf32> to vector<16x1xf32>
    %197 = vector.extract_strided_slice %160 {offsets = [1, 0], sizes = [1, 16], strides = [1, 1]} : vector<3x16xf32> to vector<1x16xf32>
    %198 = vector.broadcast %196 : vector<16x1xf32> to vector<16x16xf32>
    %199 = vector.broadcast %197 : vector<1x16xf32> to vector<16x16xf32>
    %200 = arith.addf %198, %199 : vector<16x16xf32>
    %cst_66 = arith.constant 0.000000e+00 : f32
    %201 = vector.broadcast %cst_66 : f32 to vector<16x16xf32>
    %202 = arith.cmpf ogt, %200, %201 : vector<16x16xf32>
    %cst_67 = arith.constant 3.000000e-01 : f32
    %203 = vector.broadcast %cst_67 : f32 to vector<16x16xf32>
    %204 = arith.mulf %203, %200 : vector<16x16xf32>
    %205 = arith.select %202, %200, %204 : vector<16x16xi1>, vector<16x16xf32>
    %206 = arith.addf %205, %7 : vector<16x16xf32>
    %cst_68 = arith.constant dense<0xFF800000> : vector<16xf32>
    %207 = vector.multi_reduction <maximumf>, %206, %cst_68 [1] : vector<16x16xf32> to vector<16xf32>
    %208 = vector.shape_cast %207 : vector<16xf32> to vector<16x1xf32>
    %209 = vector.broadcast %208 : vector<16x1xf32> to vector<16x16xf32>
    %210 = arith.subf %206, %209 : vector<16x16xf32>
    %211 = math.exp %210 : vector<16x16xf32>
    %cst_69 = arith.constant dense<0.000000e+00> : vector<16xf32>
    %212 = vector.multi_reduction <add>, %211, %cst_69 [1] : vector<16x16xf32> to vector<16xf32>
    %213 = vector.shape_cast %212 : vector<16xf32> to vector<16x1xf32>
    %214 = tpu.reciprocal %213 {approx = true} : vector<16x1xf32> -> vector<16x1xf32>
    %215 = vector.broadcast %214 : vector<16x1xf32> to vector<16x16xf32>
    %216 = arith.mulf %211, %215 : vector<16x16xf32>
    %217 = arith.truncf %216 : vector<16x16xf32> to vector<16x16xbf16>
    %218 = vector.extract_strided_slice %155 {offsets = [0, 2], sizes = [16, 2], strides = [1, 1]} : vector<16x36xf32> to vector<16x2xf32>
    %219 = arith.truncf %218 : vector<16x2xf32> to vector<16x2xbf16>
    %cst_70 = arith.constant dense<0.000000e+00> : vector<16x2xf32>
    %220 = tpu.matmul %217, %219, %cst_70 {dimension_numbers = #tpu.dot_dimension_numbers<[1], [0], [0], [1], [0, 0, 1, 1], [], []>} : vector<16x16xbf16>, vector<16x2xbf16>, vector<16x2xf32> -> vector<16x2xf32>
    %cst_71 = arith.constant 0.000000e+00 : f32
    %221 = vector.broadcast %cst_71 : f32 to vector<16x2xf32>
    %222 = arith.cmpf ogt, %220, %221 : vector<16x2xf32>
    %cst_72 = arith.constant 0.000000e+00 : f32
    %223 = vector.broadcast %cst_72 : f32 to vector<16x2xf32>
    %224 = arith.minimumf %220, %223 : vector<16x2xf32>
    %225 = math.exp %224 : vector<16x2xf32>
    %cst_73 = arith.constant 1.000000e+00 : f32
    %226 = vector.broadcast %cst_73 : f32 to vector<16x2xf32>
    %227 = arith.subf %225, %226 : vector<16x2xf32>
    %228 = arith.select %222, %220, %227 : vector<16x2xi1>, vector<16x2xf32>
    %c0_74 = arith.constant 0 : index
    %c0_75 = arith.constant 0 : index
    %c0_76 = arith.constant 0 : index
    %229 = vector.load %arg11[%c0_74, %c0_75, %c0_76] : memref<1x16x2xf32, #tpu.memory_space<vmem>>, vector<1x16x2xf32>
    %230 = vector.shape_cast %229 : vector<1x16x2xf32> to vector<16x2xf32>
    %231 = vector.shape_cast %228 : vector<16x2xf32> to vector<1x16x2xf32>
    tpu.vector_store %arg11[%c0_74, %c0_75, %c0_76], %231 {strides = array<i32>} : memref<1x16x2xf32, #tpu.memory_space<vmem>>, vector<1x16x2xf32>,
    %232 = vector.extract_strided_slice %158 {offsets = [0, 2], sizes = [1, 1], strides = [1, 1]} : vector<16x6xf32> to vector<1x1xf32>
    %233 = vector.extract_strided_slice %160 {offsets = [2, 0], sizes = [1, 16], strides = [1, 1]} : vector<3x16xf32> to vector<1x16xf32>
    %234 = vector.broadcast %232 : vector<1x1xf32> to vector<1x16xf32>
    %235 = arith.addf %234, %233 : vector<1x16xf32>
    %cst_77 = arith.constant 0.000000e+00 : f32
    %236 = vector.broadcast %cst_77 : f32 to vector<1x16xf32>
    %237 = arith.cmpf ogt, %235, %236 : vector<1x16xf32>
    %cst_78 = arith.constant 3.000000e-01 : f32
    %238 = vector.broadcast %cst_78 : f32 to vector<1x16xf32>
    %239 = arith.mulf %238, %235 : vector<1x16xf32>
    %240 = arith.select %237, %235, %239 : vector<1x16xi1>, vector<1x16xf32>
    %241 = vector.extract_strided_slice %7 {offsets = [0, 0], sizes = [1, 16], strides = [1, 1]} : vector<16x16xf32> to vector<1x16xf32>
    %242 = arith.addf %240, %241 : vector<1x16xf32>
    %cst_79 = arith.constant dense<0xFF800000> : vector<1xf32>
    %243 = vector.multi_reduction <maximumf>, %242, %cst_79 [1] : vector<1x16xf32> to vector<1xf32>
    %244 = vector.shape_cast %243 : vector<1xf32> to vector<1x1xf32>
    %245 = vector.broadcast %244 : vector<1x1xf32> to vector<1x16xf32>
    %246 = arith.subf %242, %245 : vector<1x16xf32>
    %247 = math.exp %246 : vector<1x16xf32>
    %cst_80 = arith.constant dense<0.000000e+00> : vector<1xf32>
    %248 = vector.multi_reduction <add>, %247, %cst_80 [1] : vector<1x16xf32> to vector<1xf32>
    %249 = vector.shape_cast %248 : vector<1xf32> to vector<1x1xf32>
    %250 = tpu.reciprocal %249 {approx = true} : vector<1x1xf32> -> vector<1x1xf32>
    %251 = vector.broadcast %250 : vector<1x1xf32> to vector<1x16xf32>
    %252 = arith.mulf %247, %251 : vector<1x16xf32>
    %253 = arith.truncf %252 : vector<1x16xf32> to vector<1x16xbf16>
    %254 = vector.extract_strided_slice %155 {offsets = [0, 4], sizes = [16, 32], strides = [1, 1]} : vector<16x36xf32> to vector<16x32xf32>
    %255 = arith.truncf %254 : vector<16x32xf32> to vector<16x32xbf16>
    %cst_81 = arith.constant dense<0.000000e+00> : vector<1x32xf32>
    %256 = tpu.matmul %253, %255, %cst_81 {dimension_numbers = #tpu.dot_dimension_numbers<[1], [0], [0], [1], [0, 0, 1, 1], [], []>} : vector<1x16xbf16>, vector<16x32xbf16>, vector<1x32xf32> -> vector<1x32xf32>
    %257 = arith.truncf %256 : vector<1x32xf32> to vector<1x32xbf16>
    %c0_82 = arith.constant 0 : index
    %c0_83 = arith.constant 0 : index
    %258 = vector.load %arg9[%c0_82, %c0_83] : memref<32x2xbf16, #tpu.memory_space<vmem>>, vector<32x2xbf16>
    %cst_84 = arith.constant dense<0.000000e+00> : vector<1x2xf32>
    %259 = tpu.matmul %257, %258, %cst_84 {dimension_numbers = #tpu.dot_dimension_numbers<[1], [0], [0], [1], [0, 0, 1, 1], [], []>} : vector<1x32xbf16>, vector<32x2xbf16>, vector<1x2xf32> -> vector<1x2xf32>
    %cst_85 = arith.constant 0.000000e+00 : f32
    %260 = vector.broadcast %cst_85 : f32 to vector<1x2xf32>
    %261 = arith.cmpf ogt, %259, %260 : vector<1x2xf32>
    %cst_86 = arith.constant 0.000000e+00 : f32
    %262 = vector.broadcast %cst_86 : f32 to vector<1x2xf32>
    %263 = arith.minimumf %259, %262 : vector<1x2xf32>
    %264 = math.exp %263 : vector<1x2xf32>
    %cst_87 = arith.constant 1.000000e+00 : f32
    %265 = vector.broadcast %cst_87 : f32 to vector<1x2xf32>
    %266 = arith.subf %264, %265 : vector<1x2xf32>
    %267 = arith.select %261, %259, %266 : vector<1x2xi1>, vector<1x2xf32>
    %c0_88 = arith.constant 0 : index
    %c0_89 = arith.constant 0 : index
    %c0_90 = arith.constant 0 : index
    %268 = vector.load %arg12[%c0_88, %c0_89, %c0_90] : memref<1x1x2xf32, #tpu.memory_space<vmem>>, vector<1x1x2xf32>
    %269 = vector.shape_cast %268 : vector<1x1x2xf32> to vector<1x2xf32>
    %270 = vector.shape_cast %267 : vector<1x2xf32> to vector<1x1x2xf32>
    tpu.vector_store %arg12[%c0_88, %c0_89, %c0_90], %270 {strides = array<i32>} : memref<1x1x2xf32, #tpu.memory_space<vmem>>, vector<1x1x2xf32>,
    return
  }
  func.func @transform_0(%arg0: i32) -> (i32, i32, i32) {
    %c0_i32 = arith.constant 0 : i32
    %c0_i32_0 = arith.constant 0 : i32
    %c0_i32_1 = arith.constant 0 : i32
    return %arg0, %c0_i32, %c0_i32_0 : i32, i32, i32
  }
  func.func @transform_1(%arg0: i32) -> (i32, i32, i32) {
    %c0_i32 = arith.constant 0 : i32
    %c0_i32_0 = arith.constant 0 : i32
    %c0_i32_1 = arith.constant 0 : i32
    return %arg0, %c0_i32, %c0_i32_0 : i32, i32, i32
  }
  func.func @transform_2(%arg0: i32) -> (i32, i32) {
    %c0_i32 = arith.constant 0 : i32
    %c0_i32_0 = arith.constant 0 : i32
    %c0_i32_1 = arith.constant 0 : i32
    return %c0_i32, %c0_i32_0 : i32, i32
  }
  func.func @transform_3(%arg0: i32) -> (i32, i32) {
    %c0_i32 = arith.constant 0 : i32
    %c0_i32_0 = arith.constant 0 : i32
    %c0_i32_1 = arith.constant 0 : i32
    return %c0_i32, %c0_i32_0 : i32, i32
  }
  func.func @transform_4(%arg0: i32) -> (i32, i32) {
    %c0_i32 = arith.constant 0 : i32
    %c0_i32_0 = arith.constant 0 : i32
    %c0_i32_1 = arith.constant 0 : i32
    return %c0_i32, %c0_i32_0 : i32, i32
  }
  func.func @transform_5(%arg0: i32) -> (i32, i32) {
    %c0_i32 = arith.constant 0 : i32
    %c0_i32_0 = arith.constant 0 : i32
    %c0_i32_1 = arith.constant 0 : i32
    return %c0_i32, %c0_i32_0 : i32, i32
  }
  func.func @transform_6(%arg0: i32) -> (i32, i32) {
    %c0_i32 = arith.constant 0 : i32
    %c0_i32_0 = arith.constant 0 : i32
    %c0_i32_1 = arith.constant 0 : i32
    return %c0_i32, %c0_i32_0 : i32, i32
  }
  func.func @transform_7(%arg0: i32) -> (i32, i32) {
    %c0_i32 = arith.constant 0 : i32
    %c0_i32_0 = arith.constant 0 : i32
    %c0_i32_1 = arith.constant 0 : i32
    return %c0_i32, %c0_i32_0 : i32, i32
  }
  func.func @transform_8(%arg0: i32) -> (i32, i32) {
    %c0_i32 = arith.constant 0 : i32
    %c0_i32_0 = arith.constant 0 : i32
    %c0_i32_1 = arith.constant 0 : i32
    return %c0_i32, %c0_i32_0 : i32, i32
  }
  func.func @transform_9(%arg0: i32) -> (i32, i32, i32) {
    %c0_i32 = arith.constant 0 : i32
    %c0_i32_0 = arith.constant 0 : i32
    %c0_i32_1 = arith.constant 0 : i32
    return %arg0, %c0_i32, %c0_i32_0 : i32, i32, i32
  }
  func.func @transform_10(%arg0: i32) -> (i32, i32, i32) {
    %c0_i32 = arith.constant 0 : i32
    %c0_i32_0 = arith.constant 0 : i32
    %c0_i32_1 = arith.constant 0 : i32
    return %arg0, %c0_i32, %c0_i32_0 : i32, i32, i32
  }
  func.func @transform_11(%arg0: i32) -> (i32, i32, i32) {
    %c0_i32 = arith.constant 0 : i32
    %c0_i32_0 = arith.constant 0 : i32
    %c0_i32_1 = arith.constant 0 : i32
    return %arg0, %c0_i32, %c0_i32_0 : i32, i32, i32
  }
}

</mosaic_0001>

<bundles_post_ra>
// kernel: gat_hotpotqa_forward.1
= control target key start
LH: loop header
LB: loop body
LE: loop exit
PB: predicated region body
PF: predicated region fallthrough
CT: control target
= control target key end

     0   :  { %17 = vsyncpa [#allocation3], 0  ;;  %s2761_s0 = inlined_call_operand.vmem [shape: s8[2,16,16], index: 0, kind: input, shape index: {}]   ;;  %s2762_s1 = inlined_call_operand.vmem [shape: f32[2,16,64], index: 1, kind: input, shape index: {}]   ;;  %s2763_s2 = inlined_call_operand.vmem [shape: bf16[64,128], index: 2, kind: input, shape index: {}]   ;;  %s2764_s3 = inlined_call_operand.vmem [shape: bf16[128,8], index: 3, kind: input, shape index: {}]   ;;  %s2765_s4 = inlined_call_operand.vmem [shape: f32[16,1], index: 4, kind: input, shape index: {}]   ;;  %s2766_s5 = inlined_call_operand.vmem [shape: f32[16,1], index: 5, kind: input, shape index: {}]   ;;  %s2767_s6 = inlined_call_operand.vmem [shape: bf16[128,36], index: 6, kind: input, shape index: {}]   ;;  %s2768_s7 = inlined_call_operand.vmem [shape: bf16[36,6], index: 7, kind: input, shape index: {}]   ;;  %s2769_s8 = inlined_call_operand.vmem [shape: bf16[32,2], index: 8, kind: input, shape index: {}]   ;;  %s2770_s9 = inlined_call_operand.vmem [shape: f32[2,16,2], index: 9, kind: output, shape index: {0}]   ;;  %s2771_s10 = inlined_call_operand.vmem [shape: f32[2,16,2], index: 10, kind: output, shape index: {1}]   ;;  %s2772_s11 = inlined_call_operand.hbm [shape: f32[2,1,2], index: 11, kind: output, shape index: {2}]  }
   0x1   :  { %19 = vsyncpa [#allocation3 + $0x1], 0  ;;  %s2387_s17 = smov 0   ;;  %s2389_s18 = smov 0  }
   0x2   :  { %s2391_s19 = smov 0   ;;  %s2393_s20 = smov 0  }
   0x3 LB: > { %s2408_s21 = sadd.s32 4294967295, %s2311_s20   ;;  %s1853_s22 = sadd.s32 4294967294, %s2311_s20   ;;  %s2311_s20 = sphi %s2393_s20, %s2791_s20   ;;  %s2307_s19 = sphi %s2391_s19, %s2790_s19   ;;  %s2303_s18 = sphi %s2389_s18, %s2789_s18   ;;  %s2299_s17 = sphi %s2387_s17, %s2788_s17  }
   0x4   : > { %s2412_s23 = sadd.s32 1, %s2311_s20   ;;  %s283_s24 = sadd.s32 1, %s2307_s19 }
   0x5   : > { %s280_s25 = ssub.s32 %s2311_s20, %s2412_s23  ;;  %p293_p0 = scmp.ne.s32.totalorder %s2307_s19, %s2303_s18 }
   0x6   : > { %p281_p1 = scmp.eq.s32.totalorder %s280_s25, 0  ;;  %p294_p2 = scmp.eq.s32.totalorder %s2408_s21, 1 }
   0x7   : > { %p299_p3 = scmp.ne.s32.totalorder %s2303_s18, %s2299_s17  ;;  %p300_p4 = scmp.eq.s32.totalorder %s1853_s22, 1 }
   0x8   : > { %s2423_s26 = scalar_select %p281_p1, %s2307_s19, %s283_s24  }
   0x9   : > { %p2425_p5 = por %p294_p2, %p293_p0  ;;  %p2429_p6 = por %p300_p4, %p299_p3 }
   0xa   : > { %2780 = sst [smem:[#allocation5_spill]] %s2423_s26  ;;  %p1856_p7 = scmp.ge.s32.totalorder %s2311_s20, 1 }
   0xb   : > { %p355_p8 = scmp.lt.s32.totalorder %s2311_s20, 3 }
   0xd   : > { %p356_p9 = pnand %p1856_p7, %p355_p8 }
   0xe   : > { %v2142_v0 = vld [vmem:[%s2763_s2] sm:$0xff] (!%p356_p9)   ;;  %v2313_v1 = vmov (!%p356_p9), 0.0   ;;  %v2143_v2 = vld [vmem:[%s2763_s2 + $0x8] sm:$0xff] (!%p356_p9)   ;;  %vm2314_vm0 = vmmov (!%p356_p9), 0   ;;  %p409_p10 = scmp.lt.s32.totalorder (!%p356_p9), %s2408_s21, 1  ;;  %v2144_v4 = vld [vmem:[%s2763_s2 + $0x10] sm:$0xff] (!%p356_p9)   ;;  %v674_v32 = vlaneseq (!%p356_p9) }
   0xf   : > { %359 = sbr.rel (%p356_p9) target bundleno = 2881 (0xb41), region = 56  ;;  %1966 = vmatprep.subr.bf16.mxu0 (!%p356_p9), %v2313_v1  ;;  %1978 = vmatprep.subr.bf16.mxu1 (!%p356_p9), %v2313_v1  ;;  %v2146_v3 = vld [vmem:[%s2764_s3] sm:$0xff] (!%p356_p9)   ;;  %v2147_v5 = vld [vmem:[%s2764_s3 + $0x8] sm:$0xff] (!%p356_p9)   ;;  %v2145_v6 = vld [vmem:[%s2763_s2 + $0x18] sm:$0xff] (!%p356_p9)   ;;  %vm475_vm1 = vcmask (!%p356_p9), 523264   ;;  %v2315_v16 = vmov (!%p356_p9), 0  }
  0x10   : > { %1967 = vmatpush3.bf16.msra.mxu0 (!%p356_p9), %v2142_v0  ;;  %1974 = vmatprep.mubr.msk.bf16.mxu0 (!%p356_p9), %vm2314_vm0, %v2313_v1  ;;  %v2148_v7 = vld [vmem:[%s2764_s3 + $0x10] sm:$0xff] (!%p356_p9)   ;;  %v2149_v10 = vld [vmem:[%s2764_s3 + $0x18] sm:$0xff] (!%p356_p9)   ;;  %v2150_v12 = vld [vmem:[%s2764_s3 + $0x20] sm:$0xff] (!%p356_p9)   ;;  %v2316_v22 = vmov (!%p356_p9), 1   ;;  %s2773_s30 = smov (!%p356_p9), 124   ;;  %v2318_v27 = vmov (!%p356_p9), 2  }
  0x11   : > { %1968 = vmatprep.subr.bf16.mxu0 (!%p356_p9), %v2313_v1  ;;  %1994 = vmatprep.mubr.msk.bf16.mxu1 (!%p356_p9), %vm2314_vm0, %v2313_v1  ;;  %v2151_v13 = vld [vmem:[%s2764_s3 + $0x28] sm:$0xff] (!%p356_p9)   ;;  %v2152_v14 = vld [vmem:[%s2764_s3 + $0x30] sm:$0xff] (!%p356_p9)   ;;  %v2153_v15 = vld [vmem:[%s2764_s3 + $0x38] sm:$0xff] (!%p356_p9)   ;;  %v2319_v28 = vmov (!%p356_p9), 3   ;;  %v2520_v35 = vshrl.u32 (!%p356_p9), %v674_v32, 7  ;;  %vm688_vm6 = vcmask (!%p356_p9), 130048  }
  0x12   : > { %1979 = vmatpush3.bf16.msra.mxu1 (!%p356_p9), %v2146_v3  ;;  %2130 = vset.pattern.permute.xlu1 (!%p356_p9), %v2315_v16  ;;  %v2320_v54 = vmov (!%p356_p9), -9e+15   ;;  %s2778_s16 = smov (!%p356_p9), 32   ;;  %s2776_s22 = smov (!%p356_p9), 64  }
  0x13   : > { %1980 = vmatprep.subr.bf16.mxu1 (!%p356_p9), %v2313_v1  ;;  %2131 = vset.pattern.permute.xlu0 (!%p356_p9), %v2316_v22  ;;  %v676_v40 = vsub.s32 (!%p356_p9), 0, %v2520_v35  ;;  %v778_v41 = vsub.s32 (!%p356_p9), 1, %v2520_v35  ;;  %v883_v44 = vsub.s32 (!%p356_p9), 2, %v2520_v35  ;;  %v987_v60 = vsub.s32 (!%p356_p9), 3, %v2520_v35  ;;  %s2783_s24 = smov (!%p356_p9), 32   ;;  %s2324_s12 = smov (!%p356_p9), 125  }
  0x14   : > { %1969 = vmatpush3.bf16.msra.mxu0 (!%p356_p9), %v2143_v2 }
  0x15   : > { %1970 = vmatprep.subr.bf16.mxu0 (!%p356_p9), %v2313_v1 }
  0x16   : > { %s2450_s14 = scalar_select %p409_p10, %s2408_s21, 1  ;;  %1981 = vmatpush3.bf16.msra.mxu1 %v2147_v5 }
  0x17   : > { %1982 = vmatprep.subr.bf16.mxu1 %v2313_v1 }
  0x18   : > { %s2459_s25 = sshll.u32 %s2450_s14, 4  ;;  %1971 = vmatpush3.bf16.msra.mxu0 %v2144_v4  ;;  %s1914_s26 = sshll.u32 %s2450_s14, 2 }
  0x19   : > { %s418_s15 = scalar_lea.vmem %s2762_s1, %s2459_s25  ;;  %1972 = vmatprep.subr.bf16.mxu0 %v2313_v1  ;;  %s2774_s14 = smov 96  }
  0x1a   : > { %v440_v8 = vld [vmem:[%s418_s15] sm:$0xff]  ;;  %v441_v9 = vld [vmem:[%s418_s15 + $0x8] sm:$0xff]  ;;  %1983 = vmatpush3.bf16.msra.mxu1 %v2148_v7  ;;  %s413_s15 = scalar_lea.vmem %s2761_s0, %s1914_s26  ;;  %s428_s26 = scalar_lea.vmem %s2771_s10, %s2459_s25 }
  0x1b   : > { %v442_v11 = vpack.c.bf16 %v441_v9, %v440_v8  ;;  %1984 = vmatprep.subr.bf16.mxu1 %v2313_v1  ;;  %v1919_v34 = vld [vmem:[%s413_s15] sm:$0xf]  }
  0x1c   : > { %1973 = vmatpush3.bf16.msra.mxu0 %v2145_v6  ;;  %v1921_v36 = vunpack.c.1.s8 %v1919_v34  ;;  %v1920_v37 = vunpack.c.0.s8 %v1919_v34 }
  0x1d   : > { %1998 = vmatprep.subr.bf16.mxu0 %v2313_v1 }
  0x1e   : > { %1985 = vmatpush3.bf16.msra.mxu1 %v2149_v10  ;;  %v435_v42 = vcvt.s32.f32 %v1921_v36  ;;  %v434_v43 = vcvt.s32.f32 %v1920_v37 }
  0x1f   : > { %1975 = vmatmul.mubr.msk.bf16.vlgmr.msra.gmra.mrb[0].mxu0 %vm475_vm1, %v442_v11  ;;  %1986 = vmatprep.subr.bf16.mxu1 %v2313_v1 }
  0x20   : > { %2000 = vmatprep.mubr.msk.bf16.mxu0 %vm2314_vm0, %v2313_v1  ;;  %vm437_vm2 = vcmp.gt.f32.partialorder %v435_v42, 0.0  ;;  %vm436_vm3 = vcmp.gt.f32.partialorder %v434_v43, 0.0 }
  0x21   : > { %v2529_v55 = vsel %vm437_vm2, 0.0, %v2320_v54  ;;  %v2531_v56 = vsel %vm436_vm3, 0.0, %v2320_v54 }
  0x22   : > { %1987 = vmatpush3.bf16.msra.mxu1 %v2150_v12 }
  0x23   : > { %1988 = vmatprep.subr.bf16.mxu1 %v2313_v1 }
  0x26   : > { %1989 = vmatpush3.bf16.msra.mxu1 %v2151_v13 }
  0x27   : > { %1990 = vmatprep.subr.bf16.mxu1 %v2313_v1 }
  0x2a   : > { %1991 = vmatpush3.bf16.msra.mxu1 %v2152_v14 }
  0x2b   : > { %1992 = vmatprep.subr.bf16.mxu1 %v2313_v1 }
  0x2e   : > { %1993 = vmatpush3.bf16.msra.mxu1 %v2153_v15 }
  0x2f   : > { %2016 = vmatprep.subr.bf16.mxu1 %v2313_v1 }
  0xf2   : > { %v513_v17 = vpop.f32.mrb[0].mxu0 }
  0xf3   : > { %v1976_v18 = vpop.f32.mrb[1].mxu0 }
  0xf4   : > { %v516_v19 = vpop.f32.mrb[2].mxu0 }
  0xf5   : > { %v2503_v20 = vpack.c.bf16 %v516_v19, %v513_v17  ;;  %v1977_v21 = vpop.f32.mrb[3].mxu0 }
  0xf7   : > { %1995 = vmatmul.mubr.bf16.vlgmr.msra.gmra.mrb[0].mxu1 %v2503_v20  ;;  %1999 = vmatpush3.bf16.msra.mxu0 %v2503_v20 }
  0xf8   : > { %2004 = vmatprep.subr.bf16.mxu0 %v2313_v1  ;;  %2018 = vmatprep.mubr.msk.bf16.mxu1 %vm2314_vm0, %v2313_v1 }
 0x1ca   : > { %v619_v23 = vpop.f32.mrb[0].mxu1 }
 0x1cb   : > { %667 = vperm.xlu1 %2130, %v619_v23   ;;  %628 = vrot.lane.b32.xlu0 %v619_v23, %s2773_s30  ;;  %v1996_v24 = vpop.f32.mrb[1].mxu1 }
 0x1cc   : > { %v622_v25 = vpop.f32.mrb[2].mxu1 }
 0x1cd   : > { %v1997_v26 = vpop.f32.mrb[3].mxu1 }
 0x1cf   : > { %671 = vperm.xlu1 %2130, %v622_v25   ;;  %630 = vrot.lane.b32.xlu0 %v622_v25, %s2773_s30  ;;  %s2786_s30 = smov 124  }
 0x1d3   : > { %2132 = vset.pattern.permute.xlu1 %v2316_v22  ;;  %769 = vperm.xlu0 %2131, %v619_v23  }
 0x1d4   : > { %773 = vperm.xlu1 %2132, %v622_v25  }
 0x1d7   : > { %2135 = vset.pattern.permute.xlu0 %v2318_v27 }
 0x1d8   : > { %2133 = vset.pattern.permute.xlu1 %v2318_v27  ;;  %878 = vperm.xlu0 %2135, %v622_v25  }
 0x1d9   : > { %874 = vperm.xlu1 %2133, %v619_v23  }
 0x1dd   : > { %2134 = vset.pattern.permute.xlu1 %v2319_v28 }
 0x1de   : > { %978 = vperm.xlu1 %2134, %v619_v23  }
 0x1e2   : > { %982 = vperm.xlu1 %2134, %v622_v25  }
 0x1e6   : > { %2136 = vset.pattern.permute.xlu1 %v2315_v16 }
 0x23d   : > { %v629_v29 = vpop.permute.xlu0 %628 }
 0x23e   : > { %634 = vxpose.xlu0.b32.start [1/2] (short) (narrow) %v629_v29, 8 }
 0x241   : > { %v631_v30 = vpop.permute.xlu0 %630 }
 0x242   : > { %635 = vxpose.xlu0.b32.end [2/2] (short) (narrow) %v631_v30, 8 }
 0x24a   : > { %v668_v31 = vpop.permute.xlu1 %667 }
 0x24e   : > { %v672_v38 = vpop.permute.xlu1 %671 }
 0x252   : > { %v770_v33 = vpop.permute.xlu0 %769 }
 0x253   : > { %v774_v45 = vpop.permute.xlu1 %773 }
 0x257   : > { %v879_v39 = vpop.permute.xlu0 %878 }
 0x258   : > { %v875_v59 = vpop.permute.xlu1 %874 }
 0x25d   : > { %v979_v13 = vpop.permute.xlu1 %978 }
 0x261   : > { %v983_v19 = vpop.permute.xlu1 %982 }
 0x26b   : > { %2137 = vset.pattern.permute.xlu0 %v2315_v16 }
 0x2be   : > { %v650_v46 = vpop.trf.xlu0 }
 0x2bf   : > { %v677_v47 = vrot.slane %v650_v46, %v676_v40  ;;  %v779_v48 = vrot.slane %v650_v46, %v778_v41  ;;  %v884_v49 = vrot.slane %v650_v46, %v883_v44  ;;  %v988_v10 = vrot.slane %v650_v46, %v987_v60 }
 0x2c1   : > { %v678_v50 = vadd.f32 %v677_v47, %v668_v31  ;;  %v679_v51 = vadd.f32 %v677_v47, %v672_v38  ;;  %v780_v52 = vadd.f32 %v779_v48, %v770_v33  ;;  %v781_v53 = vadd.f32 %v779_v48, %v774_v45 }
 0x2c2   : > { %v885_v62 = vadd.f32 %v884_v49, %v875_v59  ;;  %v886_v9 = vadd.f32 %v884_v49, %v879_v39  ;;  %v989_v16 = vadd.f32 %v988_v10, %v979_v13  ;;  %v990_v24 = vadd.f32 %v988_v10, %v983_v19 }
 0x2c3   : > { %vm681_vm4 = vcmp.gt.f32.partialorder %v679_v51, 0.0  ;;  %v683_v57 = vmul.f32 0.3, %v679_v51  ;;  %vm680_vm5 = vcmp.gt.f32.partialorder %v678_v50, 0.0  ;;  %v682_v58 = vmul.f32 0.3, %v678_v50 }
 0x2c4   : > { %vm782_vm7 = vcmp.gt.f32.partialorder %v780_v52, 0.0  ;;  %v784_v61 = vmul.f32 0.3, %v780_v52  ;;  %v785_v2 = vmul.f32 0.3, %v781_v53  ;;  %vm783_vm8 = vcmp.gt.f32.partialorder %v781_v53, 0.0 }
 0x2c5   : > { %v685_v63 = vsel %vm681_vm4, %v679_v51, %v683_v57  ;;  %v684_v0 = vsel %vm680_vm5, %v678_v50, %v682_v58  ;;  %v889_v12 = vmul.f32 0.3, %v885_v62  ;;  %vm887_vm9 = vcmp.gt.f32.partialorder %v885_v62, 0.0 }
 0x2c6   : > { %v687_v3 = vadd.f32 %v685_v63, %v2529_v55  ;;  %v686_v4 = vadd.f32 %v684_v0, %v2531_v56  ;;  %v786_v5 = vsel %vm782_vm7, %v780_v52, %v784_v61  ;;  %v787_v11 = vsel %vm783_vm8, %v781_v53, %v785_v2 }
 0x2c7   : > { %v788_v8 = vadd.f32 %v786_v5, %v2531_v56  ;;  %v789_v15 = vadd.f32 %v787_v11, %v2529_v55  ;;  %v891_v17 = vsel %vm887_vm9, %v885_v62, %v889_v12  ;;  %v890_v18 = vmul.f32 0.3, %v886_v9 }
 0x2c8   : > { %v692_v6 = vsel %vm688_vm6, %v687_v3, -inf  ;;  %v689_v7 = vsel %vm688_vm6, %v686_v4, -inf  ;;  %vm888_vm10 = vcmp.gt.f32.partialorder %v886_v9, 0.0  ;;  %v893_v23 = vadd.f32 %v891_v17, %v2531_v56 }
 0x2c9   : > { %693 = vmax.xlane.f32.xlu0 %v692_v6  ;;  %690 = vmax.xlane.f32.xlu1 %v689_v7  ;;  %v790_v14 = vsel %vm688_vm6, %v788_v8, -inf  ;;  %v793_v21 = vsel %vm688_vm6, %v789_v15, -inf  ;;  %v892_v25 = vsel %vm888_vm10, %v886_v9, %v890_v18  ;;  %v993_v26 = vmul.f32 0.3, %v989_v16 }
 0x2ca   : > { %vm991_vm11 = vcmp.gt.f32.partialorder %v989_v16, 0.0  ;;  %v895_v28 = vsel %vm688_vm6, %v893_v23, -inf  ;;  %v894_v29 = vadd.f32 %v892_v25, %v2529_v55  ;;  %v994_v31 = vmul.f32 0.3, %v990_v24 }
 0x2cb   : > { %v995_v30 = vsel %vm991_vm11, %v989_v16, %v993_v26  ;;  %vm992_vm12 = vcmp.gt.f32.partialorder %v990_v24, 0.0  ;;  %vm1105_vm5 = vcmask 261120   ;;  %vm1110_vm8 = vcmask 785408  }
 0x2cc   : > { %v898_v32 = vsel %vm688_vm6, %v894_v29, -inf  ;;  %v997_v33 = vadd.f32 %v995_v30, %v2531_v56  ;;  %v996_v34 = vsel %vm992_vm12, %v990_v24, %v994_v31  ;;  %vm1272_vm10 = vcmask 1041408  }
 0x2cd   : > { %791 = vmax.xlane.f32.xlu1 %v790_v14  ;;  %v998_v37 = vadd.f32 %v996_v34, %v2529_v55 }
 0x2ce   : > { %v999_v36 = vsel %vm688_vm6, %v997_v33, -inf }
 0x2cf   : > { %v1002_v38 = vsel %vm688_vm6, %v998_v37, -inf }
 0x2d1   : > { %794 = vmax.xlane.f32.xlu1 %v793_v21  ;;  %v1113_v21 = vld [vmem:[%s2765_s4] sm:$0xff] }
 0x2d5   : > { %896 = vmax.xlane.f32.xlu1 %v895_v28 }
 0x2d9   : > { %899 = vmax.xlane.f32.xlu1 %v898_v32 }
 0x2dd   : > { %1000 = vmax.xlane.f32.xlu1 %v999_v36 }
 0x2e1   : > { %1003 = vmax.xlane.f32.xlu1 %v1002_v38 }
 0x2f2   : > { %814 = vrot.lane.b32.xlu1 %v2503_v20, %s2774_s14  ;;  %s2784_s14 = smov 64  }
 0x356   : > { %v694_v39 = vpop.xlane.xlu0 %693  ;;  %v691_v42 = vpop.xlane.xlu1 %690 }
 0x357   : > { %v696_v43 = vsub.f32 %v687_v3, %v694_v39  ;;  %v695_v44 = vsub.f32 %v686_v4, %v691_v42 }
 0x359   : > { %v697_v45 = vmul.f32 1.442695, %v695_v44  ;;  %v699_v46 = vmul.f32 1.442695, %v696_v43 }
 0x35a   : > { %v792_v47 = vpop.xlane.xlu1 %791 }
 0x35b   : > { %v796_v48 = vsub.f32 %v788_v8, %v792_v47  ;;  %2167 = vpow2.f32 %v697_v45 }
 0x35c   : > { %2169 = vpow2.f32 %v699_v46 }
 0x35d   : > { %v798_v49 = vmul.f32 1.442695, %v796_v48 }
 0x35e   : > { %v795_v50 = vpop.xlane.xlu1 %794 }
 0x35f   : > { %v797_v51 = vsub.f32 %v789_v15, %v795_v50  ;;  %2171 = vpow2.f32 %v798_v49 }
 0x361   : > { %v800_v52 = vmul.f32 1.442695, %v797_v51 }
 0x362   : > { %v897_v53 = vpop.xlane.xlu1 %896 }
 0x363   : > { %v901_v54 = vsub.f32 %v893_v23, %v897_v53  ;;  %2173 = vpow2.f32 %v800_v52 }
 0x365   : > { %v2168_v57 = vpop.eup %2167  ;;  %v903_v58 = vmul.f32 1.442695, %v901_v54 }
 0x366   : > { %v900_v59 = vpop.xlane.xlu1 %899  ;;  %v701_v61 = vsel %vm688_vm6, %v2168_v57, 0.0  ;;  %v2170_v62 = vpop.eup %2169 }
 0x367   : > { %v902_v60 = vsub.f32 %v894_v29, %v900_v59  ;;  %702 = vadd.xlane.f32.xlu1 %v701_v61  ;;  %2175 = vpow2.f32 %v903_v58  ;;  %v704_v3 = vsel %vm688_vm6, %v2170_v62, 0.0  ;;  %v1127_v59 = vld [vmem:[%s2766_s5] sm:$0xff]  ;;  %v1114_v61 = vld [vmem:[%s2765_s4 + $0x8] sm:$0xff] }
 0x369   : > { %v905_v63 = vmul.f32 1.442695, %v902_v60  ;;  %v2172_v4 = vpop.eup %2171  ;;  %v1128_v60 = vld [vmem:[%s2766_s5 + $0x8] sm:$0xff] }
 0x36a   : > { %v1001_v0 = vpop.xlane.xlu1 %1000  ;;  %v802_v8 = vsel %vm688_vm6, %v2172_v4, 0.0 }
 0x36b   : > { %2177 = vpow2.f32 %v905_v63  ;;  %v1005_v2 = vsub.f32 %v997_v33, %v1001_v0  ;;  %705 = vadd.xlane.f32.xlu1 %v704_v3  ;;  %v2155_v63 = vld [vmem:[%s2767_s6 + $0x8] sm:$0xff]   ;;  %v2156_v0 = vld [vmem:[%s2767_s6 + $0x10] sm:$0xff]  }
 0x36d   : > { %v1007_v5 = vmul.f32 1.442695, %v1005_v2  ;;  %v2174_v9 = vpop.eup %2173 }
 0x36e   : > { %v1004_v6 = vpop.xlane.xlu1 %1003  ;;  %v805_v11 = vsel %vm688_vm6, %v2174_v9, 0.0 }
 0x36f   : > { %2179 = vpow2.f32 %v1007_v5  ;;  %v1006_v7 = vsub.f32 %v998_v37, %v1004_v6  ;;  %803 = vadd.xlane.f32.xlu1 %v802_v8 }
 0x371   : > { %v1009_v10 = vmul.f32 1.442695, %v1006_v7  ;;  %v2176_v12 = vpop.eup %2175 }
 0x372   : > { %v907_v15 = vsel %vm688_vm6, %v2176_v12, 0.0  ;;  %v815_v23 = vpop.permute.xlu1 %814 }
 0x373   : > { %2181 = vpow2.f32 %v1009_v10  ;;  %806 = vadd.xlane.f32.xlu1 %v805_v11 }
 0x375   : > { %v2178_v13 = vpop.eup %2177 }
 0x376   : > { %v910_v14 = vsel %vm688_vm6, %v2178_v13, 0.0 }
 0x377   : > { %911 = vadd.xlane.f32.xlu0 %v910_v14  ;;  %908 = vadd.xlane.f32.xlu1 %v907_v15  ;;  %v2157_v15 = vld [vmem:[%s2767_s6 + $0x18] sm:$0xff]  }
 0x379   : > { %v2180_v16 = vpop.eup %2179 }
 0x37a   : > { %v1011_v17 = vsel %vm688_vm6, %v2180_v16, 0.0 }
 0x37b   : > { %1012 = vadd.xlane.f32.xlu1 %v1011_v17 }
 0x37d   : > { %v2182_v18 = vpop.eup %2181 }
 0x37e   : > { %v1014_v19 = vsel %vm688_vm6, %v2182_v18, 0.0 }
 0x37f   : > { %1015 = vadd.xlane.f32.xlu0 %v1014_v19  ;;  %v2158_v19 = vld [vmem:[%s2767_s6 + $0x20] sm:$0xff]  }
 0x38c   : > { %1022 = vrot.lane.b32.xlu1 %v2503_v20, %s2778_s16  ;;  %s1911_s16 = sshll.u32 %s2408_s21, 4 }
 0x38d   : > { %s2719_s29 = scalar_lea.hbm %s2772_s11, %s1911_s16 }
 0x390   : > { %1117 = vperm.xlu1 %2136, %v1113_v21  }
 0x394   : > { %1131 = vperm.xlu1 %2136, %v1127_v59  }
 0x395   : > { %918 = vrot.lane.b32.xlu0 %v2503_v20, %s2776_s22 }
 0x398   : > { %1136 = vperm.xlu1 %2136, %v1128_v60   ;;  %v2163_v60 = vld [vmem:[%s2768_s7 + $0x8] sm:$0xff]  }
 0x399   : > { %1122 = vperm.xlu0 %2137, %v1114_v61  }
 0x3f4   : > { %v703_v24 = vpop.xlane.xlu1 %702 }
 0x3f5   : > { %2183 = vrcp.f32 %v703_v24 }
 0x3f8   : > { %v706_v25 = vpop.xlane.xlu1 %705 }
 0x3f9   : > { %2185 = vrcp.f32 %v706_v25 }
 0x3fc   : > { %v804_v26 = vpop.xlane.xlu1 %803 }
 0x3fd   : > { %2187 = vrcp.f32 %v804_v26 }
 0x3ff   : > { %v2184_v29 = vpop.eup %2183 }
 0x400   : > { %v807_v28 = vpop.xlane.xlu1 %806  ;;  %v709_v32 = vmul.f32 %v2184_v29, %v2168_v57 }
 0x401   : > { %2189 = vrcp.f32 %v807_v28 }
 0x403   : > { %v2186_v30 = vpop.eup %2185 }
 0x404   : > { %v912_v31 = vpop.xlane.xlu0 %911  ;;  %v710_v33 = vmul.f32 %v2186_v30, %v2170_v62  ;;  %v909_v20 = vpop.xlane.xlu1 %908  ;;  %v2154_v62 = vld [vmem:[%s2767_s6] sm:$0xff]  }
 0x405   : > { %2191 = vrcp.f32 %v912_v31 }
 0x406   : > { %2193 = vrcp.f32 %v909_v20  ;;  %v711_v34 = vpack.c.bf16 %v710_v33, %v709_v32 }
 0x407   : > { %v2188_v37 = vpop.eup %2187 }
 0x408   : > { %2001 = vmatmul.mubr.msk.bf16.vlgmr.msra.gmra.mrb[4].mxu0 %vm688_vm6, %v711_v34  ;;  %v1013_v36 = vpop.xlane.xlu1 %1012  ;;  %v810_v42 = vmul.f32 %v2188_v37, %v2172_v4  ;;  %v2159_v37 = vld [vmem:[%s2767_s6 + $0x28] sm:$0xff]  }
 0x409   : > { %2005 = vmatpush3.bf16.msra.mxu0 %v815_v23  ;;  %2006 = vmatprep.mubr.msk.bf16.mxu0 %vm2314_vm0, %v2313_v1  ;;  %2195 = vrcp.f32 %v1013_v36 }
 0x40a   : > { %2010 = vmatprep.subr.bf16.mxu0 %v2313_v1 }
 0x40b   : > { %v2190_v38 = vpop.eup %2189 }
 0x40c   : > { %v1016_v39 = vpop.xlane.xlu0 %1015  ;;  %v811_v43 = vmul.f32 %v2190_v38, %v2174_v9  ;;  %v1023_v44 = vpop.permute.xlu1 %1022 }
 0x40d   : > { %2197 = vrcp.f32 %v1016_v39  ;;  %2017 = vmatpush3.bf16.msra.mxu1 %v1023_v44 }
 0x40e   : > { %v812_v46 = vpack.c.bf16 %v811_v43, %v810_v42  ;;  %2042 = vmatprep.subr.bf16.mxu1 %v2313_v1 }
 0x40f   : > { %v2192_v45 = vpop.eup %2191 }
 0x410   : > { %v2194_v47 = vpop.eup %2193  ;;  %v919_v48 = vpop.permute.xlu0 %918  ;;  %2007 = vmatmul.mubr.msk.bf16.vlgmr.msra.gmra.mrb[8].mxu0 %vm688_vm6, %v812_v46  ;;  %v916_v49 = vmul.f32 %v2192_v45, %v2178_v13  ;;  %v2160_v46 = vld [vmem:[%s2767_s6 + $0x30] sm:$0xff]  }
 0x411   : > { %2011 = vmatpush3.bf16.msra.mxu0 %v919_v48  ;;  %2012 = vmatprep.mubr.msk.bf16.mxu0 %vm2314_vm0, %v2313_v1  ;;  %v915_v50 = vmul.f32 %v2194_v47, %v2176_v12 }
 0x412   : > { %2022 = vmatprep.subr.bf16.mxu0 %v2313_v1 }
 0x413   : > { %v2196_v51 = vpop.eup %2195  ;;  %v917_v53 = vpack.c.bf16 %v916_v49, %v915_v50 }
 0x414   : > { %v1019_v54 = vmul.f32 %v2196_v51, %v2180_v16  ;;  %v2161_v51 = vld [vmem:[%s2767_s6 + $0x38] sm:$0xff]  }
 0x417   : > { %v2198_v52 = vpop.eup %2197 }
 0x418   : > { %v1020_v57 = vmul.f32 %v2198_v52, %v2182_v18  ;;  %2013 = vmatmul.mubr.msk.bf16.vlgmr.msra.gmra.mrb[12].mxu0 %vm688_vm6, %v917_v53  ;;  %v2162_v53 = vld [vmem:[%s2768_s7] sm:$0xff]  }
 0x419   : > { %2038 = vmatprep.mubr.msk.bf16.mxu0 %vm2314_vm0, %v2313_v1  ;;  %2023 = vmatpush3.bf16.msra.mxu0 %v2154_v62 }
 0x41a   : > { %v1021_v58 = vpack.c.bf16 %v1020_v57, %v1019_v54  ;;  %2024 = vmatprep.subr.bf16.mxu0 %v2313_v1 }
 0x41c   : > { %2019 = vmatmul.mubr.msk.bf16.vlgmr.msra.gmra.mrb[4].mxu1 %vm688_vm6, %v1021_v58 }
 0x41d   : > { %2048 = vmatprep.mubr.msk.bf16.mxu1 %vm2314_vm0, %v2313_v1  ;;  %2025 = vmatpush3.bf16.msra.mxu0 %v2155_v63 }
 0x41e   : > { %2026 = vmatprep.subr.bf16.mxu0 %v2313_v1  ;;  %2043 = vmatpush3.bf16.msra.mxu1 %v2162_v53 }
 0x41f   : > { %2044 = vmatprep.subr.bf16.mxu1 %v2313_v1 }
 0x421   : > { %2027 = vmatpush3.bf16.msra.mxu0 %v2156_v0 }
 0x422   : > { %2028 = vmatprep.subr.bf16.mxu0 %v2313_v1  ;;  %2045 = vmatpush3.bf16.msra.mxu1 %v2163_v60 }
 0x423   : > { %2046 = vmatprep.subr.bf16.mxu1 %v2313_v1 }
 0x425   : > { %2029 = vmatpush3.bf16.msra.mxu0 %v2157_v15 }
 0x426   : > { %2030 = vmatprep.subr.bf16.mxu0 %v2313_v1 }
 0x429   : > { %2031 = vmatpush3.bf16.msra.mxu0 %v2158_v19 }
 0x42a   : > { %2032 = vmatprep.subr.bf16.mxu0 %v2313_v1 }
 0x42d   : > { %2033 = vmatpush3.bf16.msra.mxu0 %v2159_v37 }
 0x42e   : > { %2034 = vmatprep.subr.bf16.mxu0 %v2313_v1 }
 0x431   : > { %2035 = vmatpush3.bf16.msra.mxu0 %v2160_v46 }
 0x432   : > { %2036 = vmatprep.subr.bf16.mxu0 %v2313_v1 }
 0x435   : > { %2037 = vmatpush3.bf16.msra.mxu0 %v2161_v51 }
 0x436   : > { %2070 = vmatprep.subr.bf16.mxu0 %v2313_v1 }
 0x4db   : > { %v2603_v2 = vpop.f32.mrb[4].mxu0 }
 0x4dc   : > { %v2002_v3 = vpop.f32.mrb[5].mxu0  ;;  %v758_v62 = vmin.f32 %v2603_v2, 0.0  ;;  %vm756_vm7 = vcmp.gt.f32.partialorder %v2603_v2, 0.0 }
 0x4dd   : > { %v2605_v4 = vpop.f32.mrb[6].mxu0  ;;  %v1118_v3 = vpop.permute.xlu1 %1117 }
 0x4de   : > { %v2003_v5 = vpop.f32.mrb[7].mxu0  ;;  %v759_v63 = vmin.f32 %v2605_v4, 0.0  ;;  %v760_v0 = vmul.f32 1.442695, %v758_v62  ;;  %vm757_vm9 = vcmp.gt.f32.partialorder %v2605_v4, 0.0 }
 0x4e0   : > { %v762_v5 = vmul.f32 1.442695, %v759_v63 }
 0x4e3   : > { %v854_v6 = vpop.f32.mrb[8].mxu0 }
 0x4e4   : > { %v863_v7 = vmin.f32 %v854_v6, 0.0  ;;  %v2008_v8 = vpop.f32.mrb[9].mxu0  ;;  %vm861_vm13 = vcmp.gt.f32.partialorder %v854_v6, 0.0 }
 0x4e5   : > { %v857_v9 = vpop.f32.mrb[10].mxu0 }
 0x4e6   : > { %v865_v10 = vmul.f32 1.442695, %v863_v7  ;;  %v864_v11 = vmin.f32 %v857_v9, 0.0  ;;  %v2009_v12 = vpop.f32.mrb[11].mxu0  ;;  %vm862_vm14 = vcmp.gt.f32.partialorder %v857_v9, 0.0  ;;  %v1123_v7 = vpop.permute.xlu0 %1122 }
 0x4e8   : > { %2199 = vpow2.f32 %v865_v10  ;;  %v867_v13 = vmul.f32 1.442695, %v864_v11 }
 0x4ea   : > { %2201 = vpow2.f32 %v867_v13 }
 0x4eb   : > { %v958_v14 = vpop.f32.mrb[12].mxu0 }
 0x4ec   : > { %v967_v16 = vmin.f32 %v958_v14, 0.0  ;;  %v2014_v17 = vpop.f32.mrb[13].mxu0  ;;  %vm965_vm15 = vcmp.gt.f32.partialorder %v958_v14, 0.0 }
 0x4ed   : > { %v961_v18 = vpop.f32.mrb[14].mxu0 }
 0x4ee   : > { %v969_v21 = vmul.f32 1.442695, %v967_v16  ;;  %v968_v23 = vmin.f32 %v961_v18, 0.0  ;;  %v2015_v24 = vpop.f32.mrb[15].mxu0  ;;  %vm966_vm2 = vcmp.gt.f32.partialorder %v961_v18, 0.0 }
 0x4ef   : > { %v1062_v25 = vpop.f32.mrb[4].mxu1 }
 0x4f0   : > { %v1071_v26 = vmin.f32 %v1062_v25, 0.0  ;;  %v2020_v28 = vpop.f32.mrb[5].mxu1  ;;  %2203 = vpow2.f32 %v969_v21  ;;  %v971_v29 = vmul.f32 1.442695, %v968_v23  ;;  %vm1069_vm3 = vcmp.gt.f32.partialorder %v1062_v25, 0.0 }
 0x4f1   : > { %v1065_v30 = vpop.f32.mrb[6].mxu1 }
 0x4f2   : > { %v1073_v31 = vmul.f32 1.442695, %v1071_v26  ;;  %v1072_v32 = vmin.f32 %v1065_v30, 0.0  ;;  %v2021_v33 = vpop.f32.mrb[7].mxu1  ;;  %v2200_v20 = vpop.eup %2199  ;;  %2205 = vpow2.f32 %v971_v29  ;;  %vm1070_vm4 = vcmp.gt.f32.partialorder %v1065_v30, 0.0 }
 0x4f3   : > { %v1882_v36 = vadd.f32 -1.0, %v2200_v20 }
 0x4f4   : > { %2207 = vpow2.f32 %v1073_v31  ;;  %v1075_v34 = vmul.f32 1.442695, %v1072_v32  ;;  %v2202_v38 = vpop.eup %2201 }
 0x4f5   : > { %v871_v39 = vsel %vm861_vm13, %v854_v6, %v1882_v36  ;;  %v1883_v42 = vadd.f32 -1.0, %v2202_v38  ;;  %v1132_v6 = vpop.permute.xlu1 %1131 }
 0x4f6   : > { %2209 = vpow2.f32 %v1075_v34  ;;  %1083 = vrot.lane.b32.xlu0 %v871_v39, %s2783_s24 }
 0x4f7   : > { %v872_v43 = vsel %vm862_vm14, %v857_v9, %v1883_v42  ;;  %2211 = vpow2.f32 %v760_v0 }
 0x4f8   : > { %1085 = vrot.lane.b32.xlu1 %v872_v43, %s2783_s24  ;;  %s2785_s24 = smov 96   ;;  %2213 = vpow2.f32 %v762_v5 }
 0x4f9   : > { %v1137_v8 = vpop.permute.xlu1 %1136 }
 0x4fa   : > { %v2204_v44 = vpop.eup %2203 }
 0x4fb   : > { %v1885_v45 = vadd.f32 -1.0, %v2204_v44 }
 0x4fc   : > { %v2206_v47 = vpop.eup %2205 }
 0x4fd   : > { %v975_v49 = vsel %vm965_vm15, %v958_v14, %v1885_v45  ;;  %v1886_v50 = vadd.f32 -1.0, %v2206_v47 }
 0x4fe   : > { %v2208_v48 = vpop.eup %2207  ;;  %1091 = vrot.lane.b32.xlu0 %v975_v49, %s2784_s14 }
 0x4ff   : > { %v1888_v52 = vadd.f32 -1.0, %v2208_v48  ;;  %v976_v57 = vsel %vm966_vm2, %v961_v18, %v1886_v50  ;;  %vm1580_vm2 = vcmask 122880  }
 0x500   : > { %v2210_v54 = vpop.eup %2209  ;;  %1093 = vrot.lane.b32.xlu1 %v976_v57, %s2784_s14  ;;  %s2325_s14 = smov 126  }
 0x501   : > { %v1079_v58 = vsel %vm1069_vm3, %v1062_v25, %v1888_v52  ;;  %v1889_v59 = vadd.f32 -1.0, %v2210_v54  ;;  %v2212_v9 = vpop.eup %2211 }
 0x502   : > { %1099 = vrot.lane.b32.xlu0 %v1079_v58, %s2785_s24  ;;  %v2214_v11 = vpop.eup %2213  ;;  %v1879_v12 = vadd.f32 -1.0, %v2212_v9 }
 0x503   : > { %v1080_v61 = vsel %vm1070_vm4, %v1065_v30, %v1889_v59  ;;  %v1880_v14 = vadd.f32 -1.0, %v2214_v11  ;;  %vm1705_vm4 = vcmask 8192  }
 0x504   : > { %1101 = vrot.lane.b32.xlu1 %v1080_v61, %s2785_s24  ;;  %v766_v16 = vsel %vm756_vm7, %v2603_v2, %v1879_v12 }
 0x505   : > { %v767_v19 = vsel %vm757_vm9, %v2605_v4, %v1880_v14  ;;  %v2164_v4 = vld [vmem:[%s2768_s7 + $0x10] ss:$0 sps:$4 sm:$0x33]  }
 0x506   : > { %v1274_v20 = vsel %vm1272_vm10, %v2164_v4, 0 }
 0x507   : > { %2047 = vmatpush3.bf16.msra.mxu1 %v1274_v20 }
 0x508   : > { %2052 = vmatprep.subr.bf16.mxu1 %v2313_v1 }
 0x568   : > { %v1084_v10 = vpop.permute.xlu0 %1083 }
 0x569   : > { %v1106_v18 = vsel %vm1105_vm5, %v766_v16, %v1084_v10 }
 0x56a   : > { %v1086_v13 = vpop.permute.xlu1 %1085 }
 0x56b   : > { %v1107_v24 = vsel %vm1105_vm5, %v767_v19, %v1086_v13 }
 0x570   : > { %v1092_v15 = vpop.permute.xlu0 %1091 }
 0x571   : > { %v1108_v21 = vsel %vm475_vm1, %v1106_v18, %v1092_v15 }
 0x572   : > { %v1094_v17 = vpop.permute.xlu1 %1093 }
 0x573   : > { %v1109_v26 = vsel %vm475_vm1, %v1107_v24, %v1094_v17  ;;  %vm1268_vm1 = vcmask 293888  }
 0x574   : > { %v1100_v23 = vpop.permute.xlu0 %1099 }
 0x575   : > { %v1111_v25 = vsel %vm1110_vm8, %v1108_v21, %v1100_v23 }
 0x576   : > { %v1125_v28 = vmul.f32 %v1118_v3, %v1111_v25  ;;  %v1102_v29 = vpop.permute.xlu1 %1101 }
 0x577   : > { %v1112_v30 = vsel %vm1110_vm8, %v1109_v26, %v1102_v29 }
 0x578   : > { %v1126_v2 = vmul.f32 %v1123_v7, %v1112_v30  ;;  %v1139_v31 = vadd.f32 %v1132_v6, %v1125_v28 }
 0x57a   : > { %v1140_v32 = vadd.f32 %v1137_v8, %v1126_v2 }
 0x57c   : > { %v1141_v33 = vpack.c.bf16 %v1140_v32, %v1139_v31 }
 0x57e   : > { %2039 = vmatmul.mubr.bf16.vlgmr.msra.gmra.mrb[16].mxu0 %v1141_v33 }
 0x57f   : > { %2074 = vmatprep.mubr.msk.bf16.mxu0 %vm2314_vm0, %v2313_v1 }
 0x651   : > { %v1240_v34 = vpop.f32.mrb[16].mxu0 }
 0x652   : > { %v2040_v36 = vpop.f32.mrb[17].mxu0 }
 0x653   : > { %v1243_v37 = vpop.f32.mrb[18].mxu0 }
 0x654   : > { %v2657_v38 = vpack.c.bf16 %v1243_v37, %v1240_v34  ;;  %v2041_v39 = vpop.f32.mrb[19].mxu0 }
 0x656   : > { %2049 = vmatmul.mubr.msk.bf16.vlgmr.msra.gmra.mrb[8].mxu1 %vm1268_vm1, %v2657_v38 }
 0x657   : > { %2053 = vmatpush3.bf16.msra.mxu1 %v2657_v38  ;;  %2054 = vmatprep.mubr.msk.bf16.mxu1 %vm2314_vm0, %v2313_v1 }
 0x658   : > { %2058 = vmatprep.subr.bf16.mxu1 %v2313_v1 }
 0x729   : > { %v1310_v42 = vpop.f32.mrb[8].mxu1 }
 0x72a   : > { %1319 = vrot.lane.b32.xlu0 %v1310_v42, %s2324_s12  ;;  %v2050_v43 = vpop.f32.mrb[9].mxu1 }
 0x72b   : > { %v1313_v44 = vpop.f32.mrb[10].mxu1 }
 0x72c   : > { %1321 = vrot.lane.b32.xlu1 %v1313_v44, %s2324_s12  ;;  %v2051_v45 = vpop.f32.mrb[11].mxu1  ;;  %s2326_s12 = smov [#allocation2]  }
 0x72e   : > { %1358 = vperm.xlu0 %2137, %v1310_v42  }
 0x730   : > { %1362 = vperm.xlu1 %2136, %v1313_v44  }
 0x732   : > { %2138 = vset.pattern.permute.xlu0 %v2316_v22 }
 0x733   : > { %1462 = vperm.xlu0 %2138, %v1310_v42  }
 0x734   : > { %2139 = vset.pattern.permute.xlu1 %v2316_v22 }
 0x735   : > { %1466 = vperm.xlu1 %2139, %v1313_v44  }
 0x739   : > { %2140 = vset.pattern.permute.xlu1 %v2318_v27 }
 0x73a   : > { %1569 = vperm.xlu1 %2140, %v1310_v42  }
 0x79c   : > { %v1320_v46 = vpop.permute.xlu0 %1319 }
 0x79d   : > { %1325 = vxpose.xlu0.b32.start [1/2] (short) (narrow) %v1320_v46, 8 }
 0x79e   : > { %v1322_v47 = vpop.permute.xlu1 %1321 }
 0x7a1   : > { %1326 = vxpose.xlu0.b32.end [2/2] (short) (narrow) %v1322_v47, 8 }
 0x7ad   : > { %v1359_v48 = vpop.permute.xlu0 %1358 }
 0x7af   : > { %v1363_v49 = vpop.permute.xlu1 %1362 }
 0x7b2   : > { %v1463_v50 = vpop.permute.xlu0 %1462 }
 0x7b4   : > { %v1467_v51 = vpop.permute.xlu1 %1466 }
 0x7b9   : > { %v1570_v62 = vpop.permute.xlu1 %1569 }
 0x7ca   : > { %2141 = vset.pattern.permute.xlu0 %v2318_v27 }
 0x81d   : > { %v1341_v52 = vpop.trf.xlu0 }
 0x81e   : > { %v1368_v53 = vrot.slane %v1341_v52, %v676_v40  ;;  %v1472_v22 = vrot.slane %v1341_v52, %v778_v41  ;;  %v1573_v54 = vrot.slane %v1341_v52, 2 }
 0x820   : > { %v1369_v57 = vadd.f32 %v1368_v53, %v1359_v48  ;;  %v1370_v58 = vadd.f32 %v1368_v53, %v1363_v49  ;;  %v1473_v59 = vadd.f32 %v1472_v22, %v1463_v50  ;;  %v1474_v60 = vadd.f32 %v1472_v22, %v1467_v51 }
 0x821   : > { %v1575_v0 = vadd.f32 %v1573_v54, %v1570_v62 }
 0x822   : > { %vm1371_vm11 = vcmp.gt.f32.partialorder %v1369_v57, 0.0  ;;  %v1373_v61 = vmul.f32 0.3, %v1369_v57  ;;  %vm1372_vm12 = vcmp.gt.f32.partialorder %v1370_v58, 0.0  ;;  %v1374_v27 = vmul.f32 0.3, %v1370_v58 }
 0x823   : > { %vm1475_vm13 = vcmp.gt.f32.partialorder %v1473_v59, 0.0  ;;  %v1477_v63 = vmul.f32 0.3, %v1473_v59  ;;  %v1478_v6 = vmul.f32 0.3, %v1474_v60  ;;  %vm1476_vm14 = vcmp.gt.f32.partialorder %v1474_v60, 0.0 }
 0x824   : > { %v1375_v3 = vsel %vm1371_vm11, %v1369_v57, %v1373_v61  ;;  %v1376_v5 = vsel %vm1372_vm12, %v1370_v58, %v1374_v27  ;;  %v1577_v11 = vmul.f32 0.3, %v1575_v0  ;;  %vm1576_vm15 = vcmp.gt.f32.partialorder %v1575_v0, 0.0 }
 0x825   : > { %v1377_v40 = vadd.f32 %v1375_v3, %v2531_v56  ;;  %v1378_v35 = vadd.f32 %v1376_v5, %v2529_v55  ;;  %v1479_v41 = vsel %vm1475_vm13, %v1473_v59, %v1477_v63  ;;  %v1480_v10 = vsel %vm1476_vm14, %v1474_v60, %v1478_v6  ;;  %v2166_v3 = vld [vmem:[%s2769_s8 + $0x8] sm:$0xff]  }
 0x826   : > { %v1481_v9 = vadd.f32 %v1479_v41, %v2531_v56  ;;  %v1482_v13 = vadd.f32 %v1480_v10, %v2529_v55  ;;  %v1578_v14 = vsel %vm1576_vm15, %v1575_v0, %v1577_v11  ;;  %v2165_v0 = vld [vmem:[%s2769_s8] sm:$0xff]  }
 0x827   : > { %v1379_v7 = vsel %vm688_vm6, %v1377_v40, -inf  ;;  %v1382_v8 = vsel %vm688_vm6, %v1378_v35, -inf  ;;  %v1579_v16 = vadd.f32 %v1578_v14, %v2531_v56  ;;  %2071 = vmatpush3.bf16.msra.mxu0 %v2165_v0 }
 0x828   : > { %1380 = vmax.xlane.f32.xlu1 %v1379_v7  ;;  %1383 = vmax.xlane.f32.xlu0 %v1382_v8  ;;  %v1483_v12 = vsel %vm688_vm6, %v1481_v9, -inf  ;;  %v1486_v15 = vsel %vm688_vm6, %v1482_v13, -inf }
 0x829   : > { %v1581_v17 = vsel %vm1580_vm2, %v1579_v16, -inf  ;;  %2072 = vmatprep.subr.bf16.mxu0 %v2313_v1 }
 0x82b   : > { %2073 = vmatpush3.bf16.msra.mxu0 %v2166_v3 }
 0x82c   : > { %1484 = vmax.xlane.f32.xlu1 %v1483_v12 }
 0x830   : > { %1487 = vmax.xlane.f32.xlu1 %v1486_v15 }
 0x834   : > { %1582 = vmax.xlane.f32.xlu1 %v1581_v17 }
 0x83e   : > { %1593 = vrot.lane.b32.xlu0 %v2657_v38, %s2786_s30  ;;  %s2253_s30 = sshll.u32 %s2326_s12, 4  ;;  %s2254_s30 = int_to_ptr.vmem [resolvable:$false] %s2253_s30 }
 0x8b5   : > { %v1384_v18 = vpop.xlane.xlu0 %1383  ;;  %v1381_v19 = vpop.xlane.xlu1 %1380 }
 0x8b6   : > { %v1386_v21 = vsub.f32 %v1378_v35, %v1384_v18  ;;  %v1385_v23 = vsub.f32 %v1377_v40, %v1381_v19 }
 0x8b8   : > { %v1387_v24 = vmul.f32 1.442695, %v1385_v23  ;;  %v1389_v55 = vmul.f32 1.442695, %v1386_v21 }
 0x8b9   : > { %v1485_v25 = vpop.xlane.xlu1 %1484  ;;  %v1594_v27 = vpop.permute.xlu0 %1593 }
 0x8ba   : > { %v1489_v26 = vsub.f32 %v1481_v9, %v1485_v25  ;;  %2215 = vpow2.f32 %v1387_v24 }
 0x8bb   : > { %2217 = vpow2.f32 %v1389_v55 }
 0x8bc   : > { %v1491_v28 = vmul.f32 1.442695, %v1489_v26 }
 0x8bd   : > { %v1488_v56 = vpop.xlane.xlu1 %1487 }
 0x8be   : > { %v1490_v29 = vsub.f32 %v1482_v13, %v1488_v56  ;;  %2219 = vpow2.f32 %v1491_v28 }
 0x8c0   : > { %v1493_v30 = vmul.f32 1.442695, %v1490_v29 }
 0x8c1   : > { %v1583_v2 = vpop.xlane.xlu1 %1582 }
 0x8c2   : > { %v1584_v31 = vsub.f32 %v1579_v16, %v1583_v2  ;;  %2221 = vpow2.f32 %v1493_v30 }
 0x8c4   : > { %v2216_v32 = vpop.eup %2215  ;;  %v1585_v33 = vmul.f32 1.442695, %v1584_v31 }
 0x8c5   : > { %v1391_v4 = vsel %vm688_vm6, %v2216_v32, 0.0  ;;  %v2218_v20 = vpop.eup %2217 }
 0x8c6   : > { %1392 = vadd.xlane.f32.xlu1 %v1391_v4  ;;  %2223 = vpow2.f32 %v1585_v33  ;;  %v1394_v34 = vsel %vm688_vm6, %v2218_v20, 0.0 }
 0x8c8   : > { %v2220_v36 = vpop.eup %2219 }
 0x8c9   : > { %v1495_v37 = vsel %vm688_vm6, %v2220_v36, 0.0 }
 0x8ca   : > { %1395 = vadd.xlane.f32.xlu1 %v1394_v34 }
 0x8cc   : > { %v2222_v39 = vpop.eup %2221 }
 0x8cd   : > { %v1498_v42 = vsel %vm688_vm6, %v2222_v39, 0.0 }
 0x8ce   : > { %1496 = vadd.xlane.f32.xlu1 %v1495_v37 }
 0x8d0   : > { %v2224_v43 = vpop.eup %2223 }
 0x8d1   : > { %v1587_v44 = vsel %vm1580_vm2, %v2224_v43, 0.0 }
 0x8d2   : > { %1499 = vadd.xlane.f32.xlu1 %v1498_v42 }
 0x8d6   : > { %1588 = vadd.xlane.f32.xlu1 %v1587_v44 }
 0x8e7   : > { %1507 = vrot.lane.b32.xlu1 %v2657_v38, %s2325_s14  ;;  %s423_s14 = scalar_lea.vmem %s2770_s9, %s2459_s25  ;;  %s407_s25 = sand.u32 1, %s2303_s18  }
 0x8e8   : > { %s408_s22 = scalar_lea.vmem [#allocation2], %s407_s25 }
 0x8e9   : > { %s1736_s13 = sshll.u32 %s408_s22, 4  ;;  %s2721_s13 = int_to_ptr.vmem [resolvable:$true] %s1736_s13 }
 0x8ea   : > { %s2249_s21 = scalar_lea.vmem %s2721_s13, 16  ;;  %p2256_p0 = scmp.lt.s32.totalorder %s2721_s13, %s2254_s30 }
 0x8eb   : > { %p2250_p11 = scmp.ne.s32.totalorder %s2721_s13, %s2249_s21 }
 0x8ed   : > { %p2251_p12 = pnand %p2250_p11, %p2425_p5 }
 0x8ef   : > { %p2252_p13 = pneg %p2251_p12 }
 0x953   : > { %v1393_v45 = vpop.xlane.xlu1 %1392 }
 0x954   : > { %2225 = vrcp.f32 %v1393_v45 }
 0x957   : > { %v1396_v46 = vpop.xlane.xlu1 %1395 }
 0x958   : > { %2227 = vrcp.f32 %v1396_v46 }
 0x95b   : > { %v1497_v47 = vpop.xlane.xlu1 %1496 }
 0x95c   : > { %2229 = vrcp.f32 %v1497_v47 }
 0x95e   : > { %v2226_v49 = vpop.eup %2225 }
 0x95f   : > { %v1500_v48 = vpop.xlane.xlu1 %1499  ;;  %v1399_v51 = vmul.f32 %v2226_v49, %v2216_v32 }
 0x960   : > { %2231 = vrcp.f32 %v1500_v48 }
 0x962   : > { %v2228_v50 = vpop.eup %2227 }
 0x963   : > { %v1400_v52 = vmul.f32 %v2228_v50, %v2218_v20  ;;  %v1589_v53 = vpop.xlane.xlu1 %1588 }
 0x964   : > { %2233 = vrcp.f32 %v1589_v53 }
 0x965   : > { %v1401_v22 = vpack.c.bf16 %v1400_v52, %v1399_v51 }
 0x966   : > { %v2230_v57 = vpop.eup %2229 }
 0x967   : > { %2055 = vmatmul.mubr.msk.bf16.vlgmr.msra.gmra.mrb[12].mxu1 %vm688_vm6, %v1401_v22  ;;  %v1508_v54 = vpop.permute.xlu1 %1507  ;;  %v1503_v58 = vmul.f32 %v2230_v57, %v2220_v36 }
 0x968   : > { %2059 = vmatpush3.bf16.msra.mxu1 %v1508_v54  ;;  %2060 = vmatprep.mubr.msk.bf16.mxu1 %vm2314_vm0, %v2313_v1 }
 0x969   : > { %2064 = vmatprep.subr.bf16.mxu1 %v2313_v1 }
 0x96a   : > { %v2232_v38 = vpop.eup %2231 }
 0x96b   : > { %v1504_v59 = vmul.f32 %v2232_v38, %v2222_v39 }
 0x96d   : > { %v1505_v60 = vpack.c.bf16 %v1504_v59, %v1503_v58 }
 0x96e   : > { %v2234_v61 = vpop.eup %2233 }
 0x96f   : > { %2061 = vmatmul.mubr.msk.bf16.vlgmr.msra.gmra.mrb[16].mxu1 %vm688_vm6, %v1505_v60  ;;  %v1591_v62 = vmul.f32 %v2234_v61, %v2224_v43 }
 0x970   : > { %2065 = vmatpush3.bf16.msra.mxu1 %v1594_v27  ;;  %2066 = vmatprep.mubr.msk.bf16.mxu1 %vm2314_vm0, %v2313_v1  ;;  %vm1458_vm0 = vcmask 15360  }
 0x971   : > { %v1592_v63 = vpack.c.bf16 %v1591_v62, %v1591_v62 }
 0x977   : > { %2067 = vmatmul.mubr.msk.bf16.vlgmr.msra.gmra.mrb[20].mxu1 %vm688_vm6, %v1592_v63 }
 0xa3a   : > { %v1439_v5 = vpop.f32.mrb[12].mxu1 }
 0xa3b   : > { %v1446_v6 = vsub.f32 0.0, %v1439_v5  ;;  %v2056_v40 = vpop.f32.mrb[13].mxu1 }
 0xa3c   : > { %v1442_v35 = vpop.f32.mrb[14].mxu1 }
 0xa3d   : > { %v1448_v41 = vmul.f32 1.442695, %v1446_v6  ;;  %v1447_v7 = vsub.f32 0.0, %v1442_v35  ;;  %v2057_v8 = vpop.f32.mrb[15].mxu1 }
 0xa3f   : > { %2235 = vpow2.f32 %v1448_v41  ;;  %v1450_v9 = vmul.f32 1.442695, %v1447_v7 }
 0xa41   : > { %2237 = vpow2.f32 %v1450_v9 }
 0xa42   : > { %v1547_v10 = vpop.f32.mrb[16].mxu1 }
 0xa43   : > { %v1556_v11 = vmin.f32 %v1547_v10, 0.0  ;;  %v2062_v12 = vpop.f32.mrb[17].mxu1  ;;  %vm1554_vm6 = vcmp.gt.f32.partialorder %v1547_v10, 0.0 }
 0xa44   : > { %v1550_v13 = vpop.f32.mrb[18].mxu1 }
 0xa45   : > { %v1558_v1 = vmul.f32 1.442695, %v1556_v11  ;;  %v1557_v14 = vmin.f32 %v1550_v13, 0.0  ;;  %v2063_v15 = vpop.f32.mrb[19].mxu1  ;;  %vm1555_vm3 = vcmp.gt.f32.partialorder %v1550_v13, 0.0 }
 0xa47   : > { %2239 = vpow2.f32 %v1558_v1  ;;  %v1560_v16 = vmul.f32 1.442695, %v1557_v14 }
 0xa49   : > { %v2236_v17 = vpop.eup %2235  ;;  %2241 = vpow2.f32 %v1560_v16 }
 0xa4a   : > { %v1452_v18 = vadd.f32 1.0, %v2236_v17  ;;  %v1633_v19 = vpop.f32.mrb[20].mxu1 }
 0xa4b   : > { %v2238_v21 = vpop.eup %2237  ;;  %v1639_v23 = vpack.c.bf16 %v1633_v19, %v1633_v19  ;;  %v2068_v24 = vpop.f32.mrb[21].mxu1 }
 0xa4c   : > { %2243 = vrcp.f32 %v1452_v18  ;;  %v1453_v55 = vadd.f32 1.0, %v2238_v21  ;;  %v1636_v25 = vpop.f32.mrb[22].mxu1 }
 0xa4d   : > { %v2069_v26 = vpop.f32.mrb[23].mxu1  ;;  %2075 = vmatmul.mubr.msk.bf16.vlgmr.msra.gmra.mrb[20].mxu0 %vm1105_vm5, %v1639_v23 }
 0xa4e   : > { %2245 = vrcp.f32 %v1453_v55 }
 0xa51   : > { %v2240_v28 = vpop.eup %2239 }
 0xa52   : > { %v1904_v56 = vadd.f32 -1.0, %v2240_v28 }
 0xa53   : > { %v2242_v29 = vpop.eup %2241 }
 0xa54   : > { %v1564_v30 = vsel %vm1554_vm6, %v1547_v10, %v1904_v56  ;;  %v1905_v2 = vadd.f32 -1.0, %v2242_v29 }
 0xa55   : > { %1566 = vst.msk [vmem:[%s428_s26] sm:$0xff] %vm1458_vm0, %v1564_v30 }
 0xa56   : > { %v2244_v31 = vpop.eup %2243  ;;  %v1565_v32 = vsel %vm1555_vm3, %v1550_v13, %v1905_v2 }
 0xa57   : > { %1459 = vst.msk [vmem:[%s423_s14] sm:$0xff] %vm1458_vm0, %v2244_v31  ;;  %1567 = vst.msk [vmem:[%s428_s26 + $0x8] sm:$0xff] %vm1458_vm0, %v1565_v32  ;;  %s1718_s26 = scalar_lea.sflag [#allocation3], %s407_s25 }
 0xa58   : > { %v2246_v33 = vpop.eup %2245 }
 0xa59   : > { %1460 = vst.msk [vmem:[%s423_s14 + $0x8] sm:$0xff] %vm1458_vm0, %v2246_v33  ;;  %s2255_s14 = scalar_lea.vmem %s2254_s30, 32 }
 0xa5a   : > { %p2257_p1 = scmp.lt.s32.totalorder %s2255_s14, %s2249_s21 }
 0xa5c   : > { %p2258_p2 = por %p2257_p1, %p2256_p0 }
 0xa5e   : > { %p2259_p3 = pnand %p2258_p2, %p2252_p13 }
 0xb20   : > { %v1693_v4 = vpop.f32.mrb[20].mxu0 }
 0xb21   : > { %v1700_v20 = vmin.f32 %v1693_v4, 0.0  ;;  %v2076_v34 = vpop.f32.mrb[21].mxu0  ;;  %vm1699_vm5 = vcmp.gt.f32.partialorder %v1693_v4, 0.0 }
 0xb22   : > { %v1696_v36 = vpop.f32.mrb[22].mxu0 }
 0xb23   : > { %v1701_v37 = vmul.f32 1.442695, %v1700_v20  ;;  %v2077_v39 = vpop.f32.mrb[23].mxu0 }
 0xb25   : > { %2247 = vpow2.f32 %v1701_v37 }
 0xb2f   : > { %v2248_v42 = vpop.eup %2247 }
 0xb30   : > { %v1910_v43 = vadd.f32 -1.0, %v2248_v42 }
 0xb32   : > { %v1704_v44 = vsel %vm1699_vm5, %v1693_v4, %v1910_v43 }
 0xb33   : > { %1706 = vst.msk [vmem:[%s408_s22] sm:$0x1] %vm1705_vm4, %v1704_v44 }
 0xb34   : > { %2262 = shalt.err (!%p2259_p3)
}
 0xb35   : > { %s2263_s25 = scalar_lea.hbm %s2719_s29, 16  ;;  %s2267_s15 = scalar_lea.hbm %s2772_s11, 32 }
 0xb36   : > { %p2264_p4 = scmp.ne.s32.totalorder %s2719_s29, %s2263_s25  ;;  %p2268_p9 = scmp.lt.u32.totalorder %s2719_s29, %s2772_s11 }
 0xb37   : > { %p2269_p10 = scmp.lt.u32.totalorder %s2267_s15, %s2263_s25  ;;  %p2271_p12 = scmp.lt.u32.totalorder %s2263_s25, %s2719_s29 }
 0xb38   : > { %p2265_p7 = pnand %p2264_p4, %p2425_p5 }
 0xb39   : > { %p2270_p11 = por %p2269_p10, %p2268_p9 }
 0xb3a   : > { %p2266_p8 = pneg %p2265_p7 }
 0xb3b   : > { %p2272_p13 = por %p2271_p12, %p2270_p11 }
 0xb3d   : > { %p2273_p0 = pnand %p2272_p13, %p2266_p8 }
 0xb3f   : > { %2276 = shalt.err (!%p2273_p0)
}
 0xb40   : > { %2078 = dma.vmem_to_hbm [thread:$0]  (%p2425_p5), %s2721_s13, 16, %s2719_s29, %s1718_s26  }
 0xb41 PF: > { %p2084_p1 = scmp.ge.s32.totalorder %s2311_s20, 2  ;;  %s1764_s21 = sand.u32 1, %s2299_s17  }
 0xb42   : > { %s1765_s30 = scalar_lea.sflag [#allocation3], %s1764_s21 }
 0xb43   : > { %p2081_p2 = pnand %p2084_p1, %p2429_p6 }
 0xb45   : > { %2294 = dma.done.wait (!%p2081_p2), %s1765_s30, 16  }
 0xb46   : > { %2296 = vsyncadd (!%p2081_p2), %s1765_s30, 4294967280  ;;  %s2787_s14 = sld [smem:[#allocation5_spill]]  ;;  %p22_p3 = scmp.ge.s32.totalorder %s2412_s23, 4  }
 0xb47   : > { %s2788_s17 = smov %s2303_s18  ;;  %s2789_s18 = smov %s2307_s19 }
 0xb48   : > { %s2791_s20 = smov %s2412_s23  ;;  %24 = sbr.rel (!%p22_p3) target bundleno = 3 (0x3), region = 118 }
 0xb4c   : > { %s2790_s19 = smov %s2787_s14 }
 0xb4f   :  { %1769 = vsyncpa [#allocation3], 1 }
 0xb50   :  { %1771 = vsyncpa [#allocation3 + $0x1], 1 }

</bundles_post_ra>
